<compile_context>
chip_gen: v6e
topology: v6e:2x2x1
jax: 0.10.0
libtpu: 0.0.40
codegen_flags: <defaults>
</compile_context>

<pallas_src>
import functools
import math

import numpy as np
import jax
import jax.numpy as jnp
from jax.experimental import pallas as pl
from jax.experimental.pallas import tpu as pltpu


# ----------------------------------------------------------------------------
# Kernel-rotation parameter setup (numpy glue; replicates the PyTorch
# rotate_lifting_kernels / rotate_gconv_kernels reshapes/permutes exactly).
# ----------------------------------------------------------------------------
def rotation_op_matrices(k, n_orient, periodicity=2.0 * np.pi, disk_mask=True):
    c = (k - 1) / 2.0
    mats = np.zeros((n_orient, k * k, k * k), dtype=np.float32)
    r2_max = c * c + 1e-6
    for r in range(n_orient):
        theta = periodicity * r / n_orient
        ct, st = np.cos(theta), np.sin(theta)
        for yo in range(k):
            for xo in range(k):
                dy, dx = yo - c, xo - c
                if disk_mask and (dy * dy + dx * dx) > r2_max:
                    continue
                sy = c + ct * dy + st * dx
                sx = c - st * dy + ct * dx
                y0, x0 = int(np.floor(sy)), int(np.floor(sx))
                wy, wx = sy - y0, sx - x0
                for yy, xx, w in ((y0, x0, (1 - wy) * (1 - wx)),
                                  (y0, x0 + 1, (1 - wy) * wx),
                                  (y0 + 1, x0, wy * (1 - wx)),
                                  (y0 + 1, x0 + 1, wy * wx)):
                    if 0 <= yy < k and 0 <= xx < k and w > 1e-9:
                        mats[r, yo * k + xo, yy * k + xx] += w
    return mats


def rotate_lifting_kernels_np(kernel, n_orient, rot_mats):
    # kernel: [cOUT, cIN, k, k] -> [n_orient, cOUT, cIN, k, k]
    cOUT, cIN, kh, kw = kernel.shape
    kernel_flat = kernel.reshape(cOUT * cIN, kh * kw).T
    big_rot = rot_mats.reshape(n_orient * kh * kw, kh * kw)
    rotated = big_rot @ kernel_flat
    rotated = rotated.reshape(n_orient, kh, kw, cIN, cOUT)
    rotated = np.transpose(rotated, (0, 4, 3, 1, 2))
    return rotated


def rotate_gconv_kernels_np(kernel, rot_mats):
    # kernel: [N, cOUT, cIN, k, k] -> [N, cOUT, cIN, N, k, k]
    N, cOUT, cIN, kh, kw = kernel.shape
    kernel_flat = kernel.reshape(N * cOUT * cIN, kh * kw).T
    big_rot = rot_mats.reshape(N * kh * kw, kh * kw)
    rotated = big_rot @ kernel_flat
    rotated = rotated.reshape(N, kh, kw, N, cOUT, cIN)
    rotated = np.transpose(rotated, (3, 4, 5, 0, 1, 2))
    out = np.zeros((N, cOUT, cIN, N, kh, kw), dtype=np.float32)
    for orientation in range(N):
        kt = rotated[:, :, :, orientation, :, :]
        kt = np.transpose(kt, (1, 2, 3, 4, 0))
        kt = kt.reshape(cOUT * cIN * kh * kw, N)
        roll_matrix = np.roll(np.identity(N), orientation, axis=1).astype(np.float32)
        kt = kt @ roll_matrix
        kt = kt.reshape(cOUT, cIN, kh, kw, N)
        kt = np.transpose(kt, (0, 1, 4, 2, 3))
        out[orientation] = kt
    return out


# ----------------------------------------------------------------------------
# In-kernel helpers: masked lane shifts build the im2col matrix in VMEM.
# ----------------------------------------------------------------------------
def _taps(K):
    pad = (K - 1) // 2
    return [(kh - pad, kw - pad) for kh in range(K) for kw in range(K)]


def _lane_shift(x, off, P):
    """s[:, p] = x[:, (p + off) mod P]; wrap values are zeroed by the tap masks."""
    off = off % P
    if off == 0:
        return x
    return jnp.concatenate([x[:, off:], x[:, :off]], axis=1)


def _im2col(x, masks, K, Wo, P):
    """x: [Cin, P] flat 'same'-conv input; returns col [K*K*Cin, P]."""
    pieces = []
    for t, (dy, dx) in enumerate(_taps(K)):
        off = dy * Wo + dx
        shifted = _lane_shift(x, off, P)
        pieces.append(shifted * masks[t:t + 1, :])   # zero-pad borders / kill row wrap
    return jnp.concatenate(pieces, axis=0)


def make_tap_masks(Ho, Wo, K):
    pad = (K - 1) // 2
    ys, xs = np.meshgrid(np.arange(Ho), np.arange(Wo), indexing="ij")
    masks = np.zeros((K * K, Ho * Wo), np.float32)
    t = 0
    for kh in range(K):
        for kw in range(K):
            dy, dx = kh - pad, kw - pad
            valid = ((ys + dy >= 0) & (ys + dy < Ho) &
                     (xs + dx >= 0) & (xs + dx < Wo))
            masks[t] = valid.reshape(-1).astype(np.float32)
            t += 1
    return masks


# ----------------------------------------------------------------------------
# Pallas kernels
# ----------------------------------------------------------------------------
def _lift_conv_kernel(mask_ref, x1_ref, x2_ref, w_ref, y_ref, stat_ref, *, K, Wo, P):
    masks = mask_ref[...]
    x = jnp.concatenate([x1_ref[0], x2_ref[0]], axis=0)          # fused channel concat
    col = _im2col(x, masks, K, Wo, P)                            # [K*K*Cin, P]
    y = jnp.dot(w_ref[...], col, preferred_element_type=jnp.float32)  # [Cout, P]
    y_ref[0] = y
    s1 = jnp.sum(y, axis=1, keepdims=True)                       # BN pass-1 stats
    s2 = jnp.sum(y * y, axis=1, keepdims=True)
    stat_ref[0] = jnp.concatenate([s1, s2], axis=1)


def _bn_act_conv_kernel(mask_ref, x_ref, sc_ref, sh_ref, w_ref, y_ref, stat_ref,
                        *, K, Wo, P, slope):
    masks = mask_ref[...]
    x = x_ref[0] * sc_ref[...] + sh_ref[...]                     # fused BN affine
    x = jnp.where(x >= 0, x, slope * x)                          # fused LeakyReLU
    col = _im2col(x, masks, K, Wo, P)
    y = jnp.dot(w_ref[...], col, preferred_element_type=jnp.float32)
    y_ref[0] = y
    s1 = jnp.sum(y, axis=1, keepdims=True)
    s2 = jnp.sum(y * y, axis=1, keepdims=True)
    stat_ref[0] = jnp.concatenate([s1, s2], axis=1)


def _bn_act_max_kernel(x_ref, sc_ref, sh_ref, m_ref, stat_ref, *, Nt, Cout, slope):
    x = x_ref[0] * sc_ref[...] + sh_ref[...]
    x = jnp.where(x >= 0, x, slope * x)
    m = x[0:Cout, :]                                             # channel = theta*Cout + c
    for t in range(1, Nt):
        m = jnp.maximum(m, x[t * Cout:(t + 1) * Cout, :])
    m_ref[0] = m
    s1 = jnp.sum(m, axis=1, keepdims=True)
    s2 = jnp.sum(m * m, axis=1, keepdims=True)
    stat_ref[0] = jnp.concatenate([s1, s2], axis=1)


def _bn_act_kernel(x_ref, sc_ref, sh_ref, o_ref, *, slope):
    x = x_ref[0] * sc_ref[...] + sh_ref[...]
    o_ref[0] = jnp.where(x >= 0, x, slope * x)


# ----------------------------------------------------------------------------
# pallas_call wrappers
# ----------------------------------------------------------------------------
_VMEM_LIMIT = 32 * 1024 * 1024


def lift_conv(x1, x2, w_flat, masks, K, Wo):
    B, c1, P = x1.shape
    c2 = x2.shape[1]
    Cin = c1 + c2
    Cout, KK = w_flat.shape[0], K * K
    kern = functools.partial(_lift_conv_kernel, K=K, Wo=Wo, P=P)
    flops = 2 * B * Cout * KK * Cin * P
    bytes_acc = 4 * (B * Cin * P + Cout * KK * Cin + B * Cout * (P + 2) + KK * P)
    return pl.pallas_call(
        kern,
        out_shape=(jax.ShapeDtypeStruct((B, Cout, P), jnp.float32),
                   jax.ShapeDtypeStruct((B, Cout, 2), jnp.float32)),
        grid=(B,),
        in_specs=[
            pl.BlockSpec((KK, P), lambda b: (0, 0)),
            pl.BlockSpec((1, c1, P), lambda b: (b, 0, 0)),
            pl.BlockSpec((1, c2, P), lambda b: (b, 0, 0)),
            pl.BlockSpec((Cout, KK * Cin), lambda b: (0, 0)),
        ],
        out_specs=(pl.BlockSpec((1, Cout, P), lambda b: (b, 0, 0)),
                   pl.BlockSpec((1, Cout, 2), lambda b: (b, 0, 0))),
        compiler_params=pltpu.CompilerParams(
            dimension_semantics=("parallel",), vmem_limit_bytes=_VMEM_LIMIT),
        cost_estimate=pl.CostEstimate(flops=flops, transcendentals=0,
                                      bytes_accessed=bytes_acc),
    )(masks, x1, x2, w_flat)


def bn_act_conv(x, scale, shift, w_flat, masks, K, Wo, slope=0.2):
    B, Cin, P = x.shape
    Cout, KK = w_flat.shape[0], K * K
    kern = functools.partial(_bn_act_conv_kernel, K=K, Wo=Wo, P=P, slope=slope)
    flops = 2 * B * Cout * KK * Cin * P
    bytes_acc = 4 * (B * Cin * P + Cout * KK * Cin + B * Cout * (P + 2) + KK * P + 2 * Cin)
    return pl.pallas_call(
        kern,
        out_shape=(jax.ShapeDtypeStruct((B, Cout, P), jnp.float32),
                   jax.ShapeDtypeStruct((B, Cout, 2), jnp.float32)),
        grid=(B,),
        in_specs=[
            pl.BlockSpec((KK, P), lambda b: (0, 0)),
            pl.BlockSpec((1, Cin, P), lambda b: (b, 0, 0)),
            pl.BlockSpec((Cin, 1), lambda b: (0, 0)),
            pl.BlockSpec((Cin, 1), lambda b: (0, 0)),
            pl.BlockSpec((Cout, KK * Cin), lambda b: (0, 0)),
        ],
        out_specs=(pl.BlockSpec((1, Cout, P), lambda b: (b, 0, 0)),
                   pl.BlockSpec((1, Cout, 2), lambda b: (b, 0, 0))),
        compiler_params=pltpu.CompilerParams(
            dimension_semantics=("parallel",), vmem_limit_bytes=_VMEM_LIMIT),
        cost_estimate=pl.CostEstimate(flops=flops, transcendentals=0,
                                      bytes_accessed=bytes_acc),
    )(masks, x, scale, shift, w_flat)


def bn_act_max(x, scale, shift, Ntheta, out_c, slope=0.2):
    B, C1, P = x.shape
    kern = functools.partial(_bn_act_max_kernel, Nt=Ntheta, Cout=out_c, slope=slope)
    return pl.pallas_call(
        kern,
        out_shape=(jax.ShapeDtypeStruct((B, out_c, P), jnp.float32),
                   jax.ShapeDtypeStruct((B, out_c, 2), jnp.float32)),
        grid=(B,),
        in_specs=[
            pl.BlockSpec((1, C1, P), lambda b: (b, 0, 0)),
            pl.BlockSpec((C1, 1), lambda b: (0, 0)),
            pl.BlockSpec((C1, 1), lambda b: (0, 0)),
        ],
        out_specs=(pl.BlockSpec((1, out_c, P), lambda b: (b, 0, 0)),
                   pl.BlockSpec((1, out_c, 2), lambda b: (b, 0, 0))),
        compiler_params=pltpu.CompilerParams(dimension_semantics=("parallel",)),
    )(x, scale, shift)


def bn_act(x, scale, shift, slope=0.2):
    B, C, P = x.shape
    kern = functools.partial(_bn_act_kernel, slope=slope)
    return pl.pallas_call(
        kern,
        out_shape=jax.ShapeDtypeStruct((B, C, P), jnp.float32),
        grid=(B,),
        in_specs=[
            pl.BlockSpec((1, C, P), lambda b: (b, 0, 0)),
            pl.BlockSpec((C, 1), lambda b: (0, 0)),
            pl.BlockSpec((C, 1), lambda b: (0, 0)),
        ],
        out_specs=pl.BlockSpec((1, C, P), lambda b: (b, 0, 0)),
        compiler_params=pltpu.CompilerParams(dimension_semantics=("parallel",)),
    )(x, scale, shift)


# ----------------------------------------------------------------------------
# Parameters + forward
# ----------------------------------------------------------------------------
def init_params(key, in_c, out_c, kernel_size, Ntheta):
    k1, k2 = jax.random.split(key)
    lift = np.asarray(jax.random.normal(k1, (out_c, in_c, kernel_size, kernel_size),
                                        jnp.float32)) * math.sqrt(2.0 / (in_c * kernel_size ** 2))
    gconv = np.asarray(jax.random.normal(k2, (Ntheta, out_c, out_c, kernel_size, kernel_size),
                                         jnp.float32)) * math.sqrt(2.0 / (out_c * kernel_size ** 2))
    rot = rotation_op_matrices(kernel_size, Ntheta)

    C1 = Ntheta * out_c
    w1 = rotate_lifting_kernels_np(lift, Ntheta, rot)                 # [N, oc, ic, k, k]
    w1_oihw = w1.reshape(C1, in_c, kernel_size, kernel_size)
    w2 = rotate_gconv_kernels_np(gconv, rot)                          # [N, oc, oc, N, k, k]
    w2_oihw = w2.reshape(C1, C1, kernel_size, kernel_size)

    def flat(w):                                   # OIHW -> [O, K*K*I], (kh, kw, cin) order
        O, I, Kh, Kw = w.shape
        return np.transpose(w, (0, 2, 3, 1)).reshape(O, Kh * Kw * I)

    return {
        "w1_flat": jnp.asarray(flat(w1_oihw)),
        "w2_flat": jnp.asarray(flat(w2_oihw)),
        "w1_hwio": jnp.asarray(np.transpose(w1_oihw, (2, 3, 1, 0))),  # XLA reference only
        "w2_hwio": jnp.asarray(np.transpose(w2_oihw, (2, 3, 1, 0))),
        "bn_gamma": jnp.ones((C1,), jnp.float32),
        "bn_beta": jnp.zeros((C1,), jnp.float32),
        "bn2_gamma": jnp.ones((out_c,), jnp.float32),
        "bn2_beta": jnp.zeros((out_c,), jnp.float32),
    }


def _bn_affine(stats, gamma, beta, count, eps=1e-5):
    s = jnp.sum(stats, axis=0)                       # [C, 2] over batch partials
    mean = s[:, 0] / count
    var = jnp.maximum(s[:, 1] / count - mean * mean, 0.0)   # biased (train-mode) var
    scale = gamma * jax.lax.rsqrt(var + eps)
    shift = beta - mean * scale
    return scale.reshape(-1, 1), shift.reshape(-1, 1)


def roto_decoder_skip_block_forward(inputs_nchw, skip_nchw, params, Ntheta, out_c,
                                    kernel_size):
    B, _, H, W = inputs_nchw.shape
    Ho, Wo = 2 * H, 2 * W
    P = Ho * Wo
    K = kernel_size

    def up_flat(x):  # nearest x2 upsample, then free reshape into the flat NC(HW) layout
        x = jnp.repeat(jnp.repeat(x, 2, axis=2), 2, axis=3)
        return x.reshape(x.shape[0], x.shape[1], P).astype(jnp.float32)

    x1 = up_flat(inputs_nchw)
    x2 = up_flat(skip_nchw)
    masks = jnp.asarray(make_tap_masks(Ho, Wo, K))

    y1, st1 = lift_conv(x1, x2, params["w1_flat"], masks, K, Wo)
    sc1, sh1 = _bn_affine(st1, params["bn_gamma"], params["bn_beta"], B * P)
    y2, st2 = bn_act_conv(y1, sc1, sh1, params["w2_flat"], masks, K, Wo)
    sc2, sh2 = _bn_affine(st2, params["bn_gamma"], params["bn_beta"], B * P)
    m, st3 = bn_act_max(y2, sc2, sh2, Ntheta, out_c)
    sc3, sh3 = _bn_affine(st3, params["bn2_gamma"], params["bn2_beta"], B * P)
    out = bn_act(m, sc3, sh3)
    return out.reshape(B, out_c, Ho, Wo)             # NCHW, free reshape


# ----------------------------------------------------------------------------
# Pure-JAX reference (correctness check)
# ----------------------------------------------------------------------------
def _ref_forward(inputs, skip, params, Ntheta, out_c):
    def conv(y, w):
        dn = jax.lax.conv_dimension_numbers(y.shape, w.shape, ("NHWC", "HWIO", "NHWC"))
        return jax.lax.conv_general_dilated(y, w, (1, 1), "SAME", dimension_numbers=dn,
                                            precision=jax.lax.Precision.HIGHEST)

    def bn_lr(y, g, b):
        mean = jnp.mean(y, axis=(0, 1, 2), keepdims=True)
        var = jnp.mean((y - mean) ** 2, axis=(0, 1, 2), keepdims=True)
        z = (y - mean) * jax.lax.rsqrt(var + 1e-5) * g + b
        return jnp.where(z >= 0, z, 0.2 * z)

    x = jnp.concatenate([inputs, skip], axis=1)
    x = jnp.repeat(jnp.repeat(x, 2, axis=2), 2, axis=3)
    x = jnp.transpose(x, (0, 2, 3, 1)).astype(jnp.float32)
    x = conv(x, params["w1_hwio"])
    x = bn_lr(x, params["bn_gamma"], params["bn_beta"])
    x = conv(x, params["w2_hwio"])
    x = bn_lr(x, params["bn_gamma"], params["bn_beta"])
    B, H, W, _ = x.shape
    x = x.reshape(B, H, W, Ntheta, out_c).max(axis=3)
    x = bn_lr(x, params["bn2_gamma"], params["bn2_beta"])
    return jnp.transpose(x, (0, 3, 1, 2))


if __name__ == "__main__":
    B, in_c, out_c, K, Ntheta = 2, 4, 4, 3, 4
    H = W = 8

    key = jax.random.PRNGKey(0)
    k_in, k_skip, k_par = jax.random.split(key, 3)
    inputs = jax.random.normal(k_in, (B, in_c // 2, H, W), jnp.float32)          # [2, 2, 8, 8]
    skip = jax.random.normal(k_skip, (B, in_c - in_c // 2, H, W), jnp.float32)   # [2, 2, 8, 8]
    params = init_params(k_par, in_c, out_c, K, Ntheta)

    fwd = jax.jit(functools.partial(roto_decoder_skip_block_forward,
                                    Ntheta=Ntheta, out_c=out_c, kernel_size=K))
    out = jax.block_until_ready(fwd(inputs, skip, params))
    assert out.shape == (B, out_c, 2 * H, 2 * W)

    ref = jax.block_until_ready(_ref_forward(inputs, skip, params, Ntheta, out_c))
    np.testing.assert_allclose(np.asarray(out), np.asarray(ref), rtol=2e-2, atol=2e-2)

    print("KERNEL_OK")
</pallas_src>

<mosaic_0001>
module attributes {stable_mosaic.version = 11 : i64} {
  func.func @_bn_act_conv_kernel(%arg0: i32, %arg1: memref<9x256xf32, #tpu.memory_space<vmem>>, %arg2: memref<1x16x256xf32, #tpu.memory_space<vmem>>, %arg3: memref<16x1xf32, #tpu.memory_space<vmem>>, %arg4: memref<16x1xf32, #tpu.memory_space<vmem>>, %arg5: memref<16x144xf32, #tpu.memory_space<vmem>>, %arg6: memref<1x16x256xf32, #tpu.memory_space<vmem>>, %arg7: memref<1x16x2xf32, #tpu.memory_space<vmem>>) attributes {dimension_semantics = [#tpu.dimension_semantics<parallel>], iteration_bounds = array<i64: 2>, scalar_prefetch = 0 : i64, scratch_operands = 0 : i64, tpu.core_type = #tpu.core_type<tc>, window_params = [{pipeline_mode = #tpu.pipeline_mode<synchronous>, transform_indices = @transform_0, window_bounds = array<i64: 9, 256>}, {transform_indices = @transform_1, window_bounds = array<i64: 1, 16, 256>}, {pipeline_mode = #tpu.pipeline_mode<synchronous>, transform_indices = @transform_2, window_bounds = array<i64: 16, 1>}, {pipeline_mode = #tpu.pipeline_mode<synchronous>, transform_indices = @transform_3, window_bounds = array<i64: 16, 1>}, {pipeline_mode = #tpu.pipeline_mode<synchronous>, transform_indices = @transform_4, window_bounds = array<i64: 16, 144>}, {transform_indices = @transform_5, window_bounds = array<i64: 1, 16, 256>}, {transform_indices = @transform_6, window_bounds = array<i64: 1, 16, 2>}]} {
    %c0 = arith.constant 0 : index
    %c0_0 = arith.constant 0 : index
    %0 = vector.load %arg1[%c0, %c0_0] : memref<9x256xf32, #tpu.memory_space<vmem>>, vector<9x256xf32>
    %c0_1 = arith.constant 0 : index
    %c0_2 = arith.constant 0 : index
    %c0_3 = arith.constant 0 : index
    %1 = vector.load %arg2[%c0_1, %c0_2, %c0_3] : memref<1x16x256xf32, #tpu.memory_space<vmem>>, vector<1x16x256xf32>
    %2 = vector.shape_cast %1 : vector<1x16x256xf32> to vector<16x256xf32>
    %c0_4 = arith.constant 0 : index
    %c0_5 = arith.constant 0 : index
    %3 = vector.load %arg3[%c0_4, %c0_5] : memref<16x1xf32, #tpu.memory_space<vmem>>, vector<16x1xf32>
    %4 = vector.broadcast %3 : vector<16x1xf32> to vector<16x256xf32>
    %5 = arith.mulf %2, %4 : vector<16x256xf32>
    %c0_6 = arith.constant 0 : index
    %c0_7 = arith.constant 0 : index
    %6 = vector.load %arg4[%c0_6, %c0_7] : memref<16x1xf32, #tpu.memory_space<vmem>>, vector<16x1xf32>
    %7 = vector.broadcast %6 : vector<16x1xf32> to vector<16x256xf32>
    %8 = arith.addf %5, %7 : vector<16x256xf32>
    %cst = arith.constant 0.000000e+00 : f32
    %9 = vector.broadcast %cst : f32 to vector<16x256xf32>
    %10 = arith.cmpf oge, %8, %9 : vector<16x256xf32>
    %cst_8 = arith.constant 2.000000e-01 : f32
    %11 = vector.broadcast %cst_8 : f32 to vector<16x256xf32>
    %12 = arith.mulf %11, %8 : vector<16x256xf32>
    %13 = arith.select %10, %8, %12 : vector<16x256xi1>, vector<16x256xf32>
    %14 = vector.extract_strided_slice %13 {offsets = [0, 239], sizes = [16, 17], strides = [1, 1]} : vector<16x256xf32> to vector<16x17xf32>
    %15 = vector.extract_strided_slice %13 {offsets = [0, 0], sizes = [16, 239], strides = [1, 1]} : vector<16x256xf32> to vector<16x239xf32>
    %16 = tpu.concatenate %14, %15 in 1 : vector<16x17xf32>, vector<16x239xf32> -> vector<16x256xf32>
    %17 = vector.extract_strided_slice %0 {offsets = [0, 0], sizes = [1, 256], strides = [1, 1]} : vector<9x256xf32> to vector<1x256xf32>
    %18 = vector.broadcast %17 : vector<1x256xf32> to vector<16x256xf32>
    %19 = arith.mulf %16, %18 : vector<16x256xf32>
    %20 = vector.extract_strided_slice %13 {offsets = [0, 240], sizes = [16, 16], strides = [1, 1]} : vector<16x256xf32> to vector<16x16xf32>
    %21 = vector.extract_strided_slice %13 {offsets = [0, 0], sizes = [16, 240], strides = [1, 1]} : vector<16x256xf32> to vector<16x240xf32>
    %22 = tpu.concatenate %20, %21 in 1 : vector<16x16xf32>, vector<16x240xf32> -> vector<16x256xf32>
    %23 = vector.extract_strided_slice %0 {offsets = [1, 0], sizes = [1, 256], strides = [1, 1]} : vector<9x256xf32> to vector<1x256xf32>
    %24 = vector.broadcast %23 : vector<1x256xf32> to vector<16x256xf32>
    %25 = arith.mulf %22, %24 : vector<16x256xf32>
    %26 = vector.extract_strided_slice %13 {offsets = [0, 241], sizes = [16, 15], strides = [1, 1]} : vector<16x256xf32> to vector<16x15xf32>
    %27 = vector.extract_strided_slice %13 {offsets = [0, 0], sizes = [16, 241], strides = [1, 1]} : vector<16x256xf32> to vector<16x241xf32>
    %28 = tpu.concatenate %26, %27 in 1 : vector<16x15xf32>, vector<16x241xf32> -> vector<16x256xf32>
    %29 = vector.extract_strided_slice %0 {offsets = [2, 0], sizes = [1, 256], strides = [1, 1]} : vector<9x256xf32> to vector<1x256xf32>
    %30 = vector.broadcast %29 : vector<1x256xf32> to vector<16x256xf32>
    %31 = arith.mulf %28, %30 : vector<16x256xf32>
    %32 = vector.extract_strided_slice %13 {offsets = [0, 255], sizes = [16, 1], strides = [1, 1]} : vector<16x256xf32> to vector<16x1xf32>
    %33 = vector.extract_strided_slice %13 {offsets = [0, 0], sizes = [16, 255], strides = [1, 1]} : vector<16x256xf32> to vector<16x255xf32>
    %34 = tpu.concatenate %32, %33 in 1 : vector<16x1xf32>, vector<16x255xf32> -> vector<16x256xf32>
    %35 = vector.extract_strided_slice %0 {offsets = [3, 0], sizes = [1, 256], strides = [1, 1]} : vector<9x256xf32> to vector<1x256xf32>
    %36 = vector.broadcast %35 : vector<1x256xf32> to vector<16x256xf32>
    %37 = arith.mulf %34, %36 : vector<16x256xf32>
    %38 = vector.extract_strided_slice %0 {offsets = [4, 0], sizes = [1, 256], strides = [1, 1]} : vector<9x256xf32> to vector<1x256xf32>
    %39 = vector.broadcast %38 : vector<1x256xf32> to vector<16x256xf32>
    %40 = arith.mulf %13, %39 : vector<16x256xf32>
    %41 = vector.extract_strided_slice %13 {offsets = [0, 1], sizes = [16, 255], strides = [1, 1]} : vector<16x256xf32> to vector<16x255xf32>
    %42 = vector.extract_strided_slice %13 {offsets = [0, 0], sizes = [16, 1], strides = [1, 1]} : vector<16x256xf32> to vector<16x1xf32>
    %43 = tpu.concatenate %41, %42 in 1 : vector<16x255xf32>, vector<16x1xf32> -> vector<16x256xf32>
    %44 = vector.extract_strided_slice %0 {offsets = [5, 0], sizes = [1, 256], strides = [1, 1]} : vector<9x256xf32> to vector<1x256xf32>
    %45 = vector.broadcast %44 : vector<1x256xf32> to vector<16x256xf32>
    %46 = arith.mulf %43, %45 : vector<16x256xf32>
    %47 = vector.extract_strided_slice %13 {offsets = [0, 15], sizes = [16, 241], strides = [1, 1]} : vector<16x256xf32> to vector<16x241xf32>
    %48 = vector.extract_strided_slice %13 {offsets = [0, 0], sizes = [16, 15], strides = [1, 1]} : vector<16x256xf32> to vector<16x15xf32>
    %49 = tpu.concatenate %47, %48 in 1 : vector<16x241xf32>, vector<16x15xf32> -> vector<16x256xf32>
    %50 = vector.extract_strided_slice %0 {offsets = [6, 0], sizes = [1, 256], strides = [1, 1]} : vector<9x256xf32> to vector<1x256xf32>
    %51 = vector.broadcast %50 : vector<1x256xf32> to vector<16x256xf32>
    %52 = arith.mulf %49, %51 : vector<16x256xf32>
    %53 = vector.extract_strided_slice %13 {offsets = [0, 16], sizes = [16, 240], strides = [1, 1]} : vector<16x256xf32> to vector<16x240xf32>
    %54 = vector.extract_strided_slice %13 {offsets = [0, 0], sizes = [16, 16], strides = [1, 1]} : vector<16x256xf32> to vector<16x16xf32>
    %55 = tpu.concatenate %53, %54 in 1 : vector<16x240xf32>, vector<16x16xf32> -> vector<16x256xf32>
    %56 = vector.extract_strided_slice %0 {offsets = [7, 0], sizes = [1, 256], strides = [1, 1]} : vector<9x256xf32> to vector<1x256xf32>
    %57 = vector.broadcast %56 : vector<1x256xf32> to vector<16x256xf32>
    %58 = arith.mulf %55, %57 : vector<16x256xf32>
    %59 = vector.extract_strided_slice %13 {offsets = [0, 17], sizes = [16, 239], strides = [1, 1]} : vector<16x256xf32> to vector<16x239xf32>
    %60 = vector.extract_strided_slice %13 {offsets = [0, 0], sizes = [16, 17], strides = [1, 1]} : vector<16x256xf32> to vector<16x17xf32>
    %61 = tpu.concatenate %59, %60 in 1 : vector<16x239xf32>, vector<16x17xf32> -> vector<16x256xf32>
    %62 = vector.extract_strided_slice %0 {offsets = [8, 0], sizes = [1, 256], strides = [1, 1]} : vector<9x256xf32> to vector<1x256xf32>
    %63 = vector.broadcast %62 : vector<1x256xf32> to vector<16x256xf32>
    %64 = arith.mulf %61, %63 : vector<16x256xf32>
    %65 = tpu.concatenate %19, %25, %31, %37, %40, %46, %52, %58, %64 in 0 : vector<16x256xf32>, vector<16x256xf32>, vector<16x256xf32>, vector<16x256xf32>, vector<16x256xf32>, vector<16x256xf32>, vector<16x256xf32>, vector<16x256xf32>, vector<16x256xf32> -> vector<144x256xf32>
    %c0_9 = arith.constant 0 : index
    %c0_10 = arith.constant 0 : index
    %66 = vector.load %arg5[%c0_9, %c0_10] : memref<16x144xf32, #tpu.memory_space<vmem>>, vector<16x144xf32>
    %cst_11 = arith.constant dense<0.000000e+00> : vector<16x256xf32>
    %67 = tpu.matmul %66, %65, %cst_11 {dimension_numbers = #tpu.dot_dimension_numbers<[1], [0], [0], [1], [0, 0, 1, 1], [], []>} : vector<16x144xf32>, vector<144x256xf32>, vector<16x256xf32> -> vector<16x256xf32>
    %c0_12 = arith.constant 0 : index
    %c0_13 = arith.constant 0 : index
    %c0_14 = arith.constant 0 : index
    %68 = vector.load %arg6[%c0_12, %c0_13, %c0_14] : memref<1x16x256xf32, #tpu.memory_space<vmem>>, vector<1x16x256xf32>
    %69 = vector.shape_cast %68 : vector<1x16x256xf32> to vector<16x256xf32>
    %70 = vector.shape_cast %67 : vector<16x256xf32> to vector<1x16x256xf32>
    tpu.vector_store %arg6[%c0_12, %c0_13, %c0_14], %70 {strides = array<i32>} : memref<1x16x256xf32, #tpu.memory_space<vmem>>, vector<1x16x256xf32>,
    %cst_15 = arith.constant dense<0.000000e+00> : vector<16xf32>
    %71 = vector.multi_reduction <add>, %67, %cst_15 [1] : vector<16x256xf32> to vector<16xf32>
    %72 = vector.shape_cast %71 : vector<16xf32> to vector<16x1xf32>
    %73 = arith.mulf %67, %67 : vector<16x256xf32>
    %cst_16 = arith.constant dense<0.000000e+00> : vector<16xf32>
    %74 = vector.multi_reduction <add>, %73, %cst_16 [1] : vector<16x256xf32> to vector<16xf32>
    %75 = vector.shape_cast %74 : vector<16xf32> to vector<16x1xf32>
    %76 = tpu.concatenate %72, %75 in 1 : vector<16x1xf32>, vector<16x1xf32> -> vector<16x2xf32>
    %c0_17 = arith.constant 0 : index
    %c0_18 = arith.constant 0 : index
    %c0_19 = arith.constant 0 : index
    %77 = vector.load %arg7[%c0_17, %c0_18, %c0_19] : memref<1x16x2xf32, #tpu.memory_space<vmem>>, vector<1x16x2xf32>
    %78 = vector.shape_cast %77 : vector<1x16x2xf32> to vector<16x2xf32>
    %79 = vector.shape_cast %76 : vector<16x2xf32> to vector<1x16x2xf32>
    tpu.vector_store %arg7[%c0_17, %c0_18, %c0_19], %79 {strides = array<i32>} : memref<1x16x2xf32, #tpu.memory_space<vmem>>, vector<1x16x2xf32>,
    return
  }
  func.func @transform_0(%arg0: i32) -> (i32, i32) {
    %c0_i32 = arith.constant 0 : i32
    %c0_i32_0 = arith.constant 0 : i32
    %c0_i32_1 = arith.constant 0 : i32
    return %c0_i32, %c0_i32_0 : i32, i32
  }
  func.func @transform_1(%arg0: i32) -> (i32, i32, i32) {
    %c0_i32 = arith.constant 0 : i32
    %c0_i32_0 = arith.constant 0 : i32
    %c0_i32_1 = arith.constant 0 : i32
    return %arg0, %c0_i32, %c0_i32_0 : i32, i32, i32
  }
  func.func @transform_2(%arg0: i32) -> (i32, i32) {
    %c0_i32 = arith.constant 0 : i32
    %c0_i32_0 = arith.constant 0 : i32
    %c0_i32_1 = arith.constant 0 : i32
    return %c0_i32, %c0_i32_0 : i32, i32
  }
  func.func @transform_3(%arg0: i32) -> (i32, i32) {
    %c0_i32 = arith.constant 0 : i32
    %c0_i32_0 = arith.constant 0 : i32
    %c0_i32_1 = arith.constant 0 : i32
    return %c0_i32, %c0_i32_0 : i32, i32
  }
  func.func @transform_4(%arg0: i32) -> (i32, i32) {
    %c0_i32 = arith.constant 0 : i32
    %c0_i32_0 = arith.constant 0 : i32
    %c0_i32_1 = arith.constant 0 : i32
    return %c0_i32, %c0_i32_0 : i32, i32
  }
  func.func @transform_5(%arg0: i32) -> (i32, i32, i32) {
    %c0_i32 = arith.constant 0 : i32
    %c0_i32_0 = arith.constant 0 : i32
    %c0_i32_1 = arith.constant 0 : i32
    return %arg0, %c0_i32, %c0_i32_0 : i32, i32, i32
  }
  func.func @transform_6(%arg0: i32) -> (i32, i32, i32) {
    %c0_i32 = arith.constant 0 : i32
    %c0_i32_0 = arith.constant 0 : i32
    %c0_i32_1 = arith.constant 0 : i32
    return %arg0, %c0_i32, %c0_i32_0 : i32, i32, i32
  }
}

module attributes {stable_mosaic.version = 11 : i64} {
  func.func @_lift_conv_kernel(%arg0: i32, %arg1: memref<9x256xf32, #tpu.memory_space<vmem>>, %arg2: memref<1x2x256xf32, #tpu.memory_space<vmem>>, %arg3: memref<1x2x256xf32, #tpu.memory_space<vmem>>, %arg4: memref<16x36xf32, #tpu.memory_space<vmem>>, %arg5: memref<1x16x256xf32, #tpu.memory_space<vmem>>, %arg6: memref<1x16x2xf32, #tpu.memory_space<vmem>>) attributes {dimension_semantics = [#tpu.dimension_semantics<parallel>], iteration_bounds = array<i64: 2>, scalar_prefetch = 0 : i64, scratch_operands = 0 : i64, tpu.core_type = #tpu.core_type<tc>, window_params = [{pipeline_mode = #tpu.pipeline_mode<synchronous>, transform_indices = @transform_0, window_bounds = array<i64: 9, 256>}, {transform_indices = @transform_1, window_bounds = array<i64: 1, 2, 256>}, {transform_indices = @transform_2, window_bounds = array<i64: 1, 2, 256>}, {pipeline_mode = #tpu.pipeline_mode<synchronous>, transform_indices = @transform_3, window_bounds = array<i64: 16, 36>}, {transform_indices = @transform_4, window_bounds = array<i64: 1, 16, 256>}, {transform_indices = @transform_5, window_bounds = array<i64: 1, 16, 2>}]} {
    %c0 = arith.constant 0 : index
    %c0_0 = arith.constant 0 : index
    %0 = vector.load %arg1[%c0, %c0_0] : memref<9x256xf32, #tpu.memory_space<vmem>>, vector<9x256xf32>
    %c0_1 = arith.constant 0 : index
    %c0_2 = arith.constant 0 : index
    %c0_3 = arith.constant 0 : index
    %1 = vector.load %arg2[%c0_1, %c0_2, %c0_3] : memref<1x2x256xf32, #tpu.memory_space<vmem>>, vector<1x2x256xf32>
    %2 = vector.shape_cast %1 : vector<1x2x256xf32> to vector<2x256xf32>
    %c0_4 = arith.constant 0 : index
    %c0_5 = arith.constant 0 : index
    %c0_6 = arith.constant 0 : index
    %3 = vector.load %arg3[%c0_4, %c0_5, %c0_6] : memref<1x2x256xf32, #tpu.memory_space<vmem>>, vector<1x2x256xf32>
    %4 = vector.shape_cast %3 : vector<1x2x256xf32> to vector<2x256xf32>
    %5 = tpu.concatenate %2, %4 in 0 : vector<2x256xf32>, vector<2x256xf32> -> vector<4x256xf32>
    %6 = vector.extract_strided_slice %5 {offsets = [0, 239], sizes = [4, 17], strides = [1, 1]} : vector<4x256xf32> to vector<4x17xf32>
    %7 = vector.extract_strided_slice %5 {offsets = [0, 0], sizes = [4, 239], strides = [1, 1]} : vector<4x256xf32> to vector<4x239xf32>
    %8 = tpu.concatenate %6, %7 in 1 : vector<4x17xf32>, vector<4x239xf32> -> vector<4x256xf32>
    %9 = vector.extract_strided_slice %0 {offsets = [0, 0], sizes = [1, 256], strides = [1, 1]} : vector<9x256xf32> to vector<1x256xf32>
    %10 = vector.broadcast %9 : vector<1x256xf32> to vector<4x256xf32>
    %11 = arith.mulf %8, %10 : vector<4x256xf32>
    %12 = vector.extract_strided_slice %5 {offsets = [0, 240], sizes = [4, 16], strides = [1, 1]} : vector<4x256xf32> to vector<4x16xf32>
    %13 = vector.extract_strided_slice %5 {offsets = [0, 0], sizes = [4, 240], strides = [1, 1]} : vector<4x256xf32> to vector<4x240xf32>
    %14 = tpu.concatenate %12, %13 in 1 : vector<4x16xf32>, vector<4x240xf32> -> vector<4x256xf32>
    %15 = vector.extract_strided_slice %0 {offsets = [1, 0], sizes = [1, 256], strides = [1, 1]} : vector<9x256xf32> to vector<1x256xf32>
    %16 = vector.broadcast %15 : vector<1x256xf32> to vector<4x256xf32>
    %17 = arith.mulf %14, %16 : vector<4x256xf32>
    %18 = vector.extract_strided_slice %5 {offsets = [0, 241], sizes = [4, 15], strides = [1, 1]} : vector<4x256xf32> to vector<4x15xf32>
    %19 = vector.extract_strided_slice %5 {offsets = [0, 0], sizes = [4, 241], strides = [1, 1]} : vector<4x256xf32> to vector<4x241xf32>
    %20 = tpu.concatenate %18, %19 in 1 : vector<4x15xf32>, vector<4x241xf32> -> vector<4x256xf32>
    %21 = vector.extract_strided_slice %0 {offsets = [2, 0], sizes = [1, 256], strides = [1, 1]} : vector<9x256xf32> to vector<1x256xf32>
    %22 = vector.broadcast %21 : vector<1x256xf32> to vector<4x256xf32>
    %23 = arith.mulf %20, %22 : vector<4x256xf32>
    %24 = vector.extract_strided_slice %5 {offsets = [0, 255], sizes = [4, 1], strides = [1, 1]} : vector<4x256xf32> to vector<4x1xf32>
    %25 = vector.extract_strided_slice %5 {offsets = [0, 0], sizes = [4, 255], strides = [1, 1]} : vector<4x256xf32> to vector<4x255xf32>
    %26 = tpu.concatenate %24, %25 in 1 : vector<4x1xf32>, vector<4x255xf32> -> vector<4x256xf32>
    %27 = vector.extract_strided_slice %0 {offsets = [3, 0], sizes = [1, 256], strides = [1, 1]} : vector<9x256xf32> to vector<1x256xf32>
    %28 = vector.broadcast %27 : vector<1x256xf32> to vector<4x256xf32>
    %29 = arith.mulf %26, %28 : vector<4x256xf32>
    %30 = vector.extract_strided_slice %0 {offsets = [4, 0], sizes = [1, 256], strides = [1, 1]} : vector<9x256xf32> to vector<1x256xf32>
    %31 = vector.broadcast %30 : vector<1x256xf32> to vector<4x256xf32>
    %32 = arith.mulf %5, %31 : vector<4x256xf32>
    %33 = vector.extract_strided_slice %5 {offsets = [0, 1], sizes = [4, 255], strides = [1, 1]} : vector<4x256xf32> to vector<4x255xf32>
    %34 = vector.extract_strided_slice %5 {offsets = [0, 0], sizes = [4, 1], strides = [1, 1]} : vector<4x256xf32> to vector<4x1xf32>
    %35 = tpu.concatenate %33, %34 in 1 : vector<4x255xf32>, vector<4x1xf32> -> vector<4x256xf32>
    %36 = vector.extract_strided_slice %0 {offsets = [5, 0], sizes = [1, 256], strides = [1, 1]} : vector<9x256xf32> to vector<1x256xf32>
    %37 = vector.broadcast %36 : vector<1x256xf32> to vector<4x256xf32>
    %38 = arith.mulf %35, %37 : vector<4x256xf32>
    %39 = vector.extract_strided_slice %5 {offsets = [0, 15], sizes = [4, 241], strides = [1, 1]} : vector<4x256xf32> to vector<4x241xf32>
    %40 = vector.extract_strided_slice %5 {offsets = [0, 0], sizes = [4, 15], strides = [1, 1]} : vector<4x256xf32> to vector<4x15xf32>
    %41 = tpu.concatenate %39, %40 in 1 : vector<4x241xf32>, vector<4x15xf32> -> vector<4x256xf32>
    %42 = vector.extract_strided_slice %0 {offsets = [6, 0], sizes = [1, 256], strides = [1, 1]} : vector<9x256xf32> to vector<1x256xf32>
    %43 = vector.broadcast %42 : vector<1x256xf32> to vector<4x256xf32>
    %44 = arith.mulf %41, %43 : vector<4x256xf32>
    %45 = vector.extract_strided_slice %5 {offsets = [0, 16], sizes = [4, 240], strides = [1, 1]} : vector<4x256xf32> to vector<4x240xf32>
    %46 = vector.extract_strided_slice %5 {offsets = [0, 0], sizes = [4, 16], strides = [1, 1]} : vector<4x256xf32> to vector<4x16xf32>
    %47 = tpu.concatenate %45, %46 in 1 : vector<4x240xf32>, vector<4x16xf32> -> vector<4x256xf32>
    %48 = vector.extract_strided_slice %0 {offsets = [7, 0], sizes = [1, 256], strides = [1, 1]} : vector<9x256xf32> to vector<1x256xf32>
    %49 = vector.broadcast %48 : vector<1x256xf32> to vector<4x256xf32>
    %50 = arith.mulf %47, %49 : vector<4x256xf32>
    %51 = vector.extract_strided_slice %5 {offsets = [0, 17], sizes = [4, 239], strides = [1, 1]} : vector<4x256xf32> to vector<4x239xf32>
    %52 = vector.extract_strided_slice %5 {offsets = [0, 0], sizes = [4, 17], strides = [1, 1]} : vector<4x256xf32> to vector<4x17xf32>
    %53 = tpu.concatenate %51, %52 in 1 : vector<4x239xf32>, vector<4x17xf32> -> vector<4x256xf32>
    %54 = vector.extract_strided_slice %0 {offsets = [8, 0], sizes = [1, 256], strides = [1, 1]} : vector<9x256xf32> to vector<1x256xf32>
    %55 = vector.broadcast %54 : vector<1x256xf32> to vector<4x256xf32>
    %56 = arith.mulf %53, %55 : vector<4x256xf32>
    %57 = tpu.concatenate %11, %17, %23, %29, %32, %38, %44, %50, %56 in 0 : vector<4x256xf32>, vector<4x256xf32>, vector<4x256xf32>, vector<4x256xf32>, vector<4x256xf32>, vector<4x256xf32>, vector<4x256xf32>, vector<4x256xf32>, vector<4x256xf32> -> vector<36x256xf32>
    %c0_7 = arith.constant 0 : index
    %c0_8 = arith.constant 0 : index
    %58 = vector.load %arg4[%c0_7, %c0_8] : memref<16x36xf32, #tpu.memory_space<vmem>>, vector<16x36xf32>
    %cst = arith.constant dense<0.000000e+00> : vector<16x256xf32>
    %59 = tpu.matmul %58, %57, %cst {dimension_numbers = #tpu.dot_dimension_numbers<[1], [0], [0], [1], [0, 0, 1, 1], [], []>} : vector<16x36xf32>, vector<36x256xf32>, vector<16x256xf32> -> vector<16x256xf32>
    %c0_9 = arith.constant 0 : index
    %c0_10 = arith.constant 0 : index
    %c0_11 = arith.constant 0 : index
    %60 = vector.load %arg5[%c0_9, %c0_10, %c0_11] : memref<1x16x256xf32, #tpu.memory_space<vmem>>, vector<1x16x256xf32>
    %61 = vector.shape_cast %60 : vector<1x16x256xf32> to vector<16x256xf32>
    %62 = vector.shape_cast %59 : vector<16x256xf32> to vector<1x16x256xf32>
    tpu.vector_store %arg5[%c0_9, %c0_10, %c0_11], %62 {strides = array<i32>} : memref<1x16x256xf32, #tpu.memory_space<vmem>>, vector<1x16x256xf32>,
    %cst_12 = arith.constant dense<0.000000e+00> : vector<16xf32>
    %63 = vector.multi_reduction <add>, %59, %cst_12 [1] : vector<16x256xf32> to vector<16xf32>
    %64 = vector.shape_cast %63 : vector<16xf32> to vector<16x1xf32>
    %65 = arith.mulf %59, %59 : vector<16x256xf32>
    %cst_13 = arith.constant dense<0.000000e+00> : vector<16xf32>
    %66 = vector.multi_reduction <add>, %65, %cst_13 [1] : vector<16x256xf32> to vector<16xf32>
    %67 = vector.shape_cast %66 : vector<16xf32> to vector<16x1xf32>
    %68 = tpu.concatenate %64, %67 in 1 : vector<16x1xf32>, vector<16x1xf32> -> vector<16x2xf32>
    %c0_14 = arith.constant 0 : index
    %c0_15 = arith.constant 0 : index
    %c0_16 = arith.constant 0 : index
    %69 = vector.load %arg6[%c0_14, %c0_15, %c0_16] : memref<1x16x2xf32, #tpu.memory_space<vmem>>, vector<1x16x2xf32>
    %70 = vector.shape_cast %69 : vector<1x16x2xf32> to vector<16x2xf32>
    %71 = vector.shape_cast %68 : vector<16x2xf32> to vector<1x16x2xf32>
    tpu.vector_store %arg6[%c0_14, %c0_15, %c0_16], %71 {strides = array<i32>} : memref<1x16x2xf32, #tpu.memory_space<vmem>>, vector<1x16x2xf32>,
    return
  }
  func.func @transform_0(%arg0: i32) -> (i32, i32) {
    %c0_i32 = arith.constant 0 : i32
    %c0_i32_0 = arith.constant 0 : i32
    %c0_i32_1 = arith.constant 0 : i32
    return %c0_i32, %c0_i32_0 : i32, i32
  }
  func.func @transform_1(%arg0: i32) -> (i32, i32, i32) {
    %c0_i32 = arith.constant 0 : i32
    %c0_i32_0 = arith.constant 0 : i32
    %c0_i32_1 = arith.constant 0 : i32
    return %arg0, %c0_i32, %c0_i32_0 : i32, i32, i32
  }
  func.func @transform_2(%arg0: i32) -> (i32, i32, i32) {
    %c0_i32 = arith.constant 0 : i32
    %c0_i32_0 = arith.constant 0 : i32
    %c0_i32_1 = arith.constant 0 : i32
    return %arg0, %c0_i32, %c0_i32_0 : i32, i32, i32
  }
  func.func @transform_3(%arg0: i32) -> (i32, i32) {
    %c0_i32 = arith.constant 0 : i32
    %c0_i32_0 = arith.constant 0 : i32
    %c0_i32_1 = arith.constant 0 : i32
    return %c0_i32, %c0_i32_0 : i32, i32
  }
  func.func @transform_4(%arg0: i32) -> (i32, i32, i32) {
    %c0_i32 = arith.constant 0 : i32
    %c0_i32_0 = arith.constant 0 : i32
    %c0_i32_1 = arith.constant 0 : i32
    return %arg0, %c0_i32, %c0_i32_0 : i32, i32, i32
  }
  func.func @transform_5(%arg0: i32) -> (i32, i32, i32) {
    %c0_i32 = arith.constant 0 : i32
    %c0_i32_0 = arith.constant 0 : i32
    %c0_i32_1 = arith.constant 0 : i32
    return %arg0, %c0_i32, %c0_i32_0 : i32, i32, i32
  }
}

module attributes {stable_mosaic.version = 11 : i64} {
  func.func @_bn_act_max_kernel(%arg0: i32, %arg1: memref<1x16x256xf32, #tpu.memory_space<vmem>>, %arg2: memref<16x1xf32, #tpu.memory_space<vmem>>, %arg3: memref<16x1xf32, #tpu.memory_space<vmem>>, %arg4: memref<1x4x256xf32, #tpu.memory_space<vmem>>, %arg5: memref<1x4x2xf32, #tpu.memory_space<vmem>>) attributes {dimension_semantics = [#tpu.dimension_semantics<parallel>], iteration_bounds = array<i64: 2>, scalar_prefetch = 0 : i64, scratch_operands = 0 : i64, tpu.core_type = #tpu.core_type<tc>, window_params = [{transform_indices = @transform_0, window_bounds = array<i64: 1, 16, 256>}, {pipeline_mode = #tpu.pipeline_mode<synchronous>, transform_indices = @transform_1, window_bounds = array<i64: 16, 1>}, {pipeline_mode = #tpu.pipeline_mode<synchronous>, transform_indices = @transform_2, window_bounds = array<i64: 16, 1>}, {transform_indices = @transform_3, window_bounds = array<i64: 1, 4, 256>}, {transform_indices = @transform_4, window_bounds = array<i64: 1, 4, 2>}]} {
    %c0 = arith.constant 0 : index
    %c0_0 = arith.constant 0 : index
    %c0_1 = arith.constant 0 : index
    %0 = vector.load %arg1[%c0, %c0_0, %c0_1] : memref<1x16x256xf32, #tpu.memory_space<vmem>>, vector<1x16x256xf32>
    %1 = vector.shape_cast %0 : vector<1x16x256xf32> to vector<16x256xf32>
    %c0_2 = arith.constant 0 : index
    %c0_3 = arith.constant 0 : index
    %2 = vector.load %arg2[%c0_2, %c0_3] : memref<16x1xf32, #tpu.memory_space<vmem>>, vector<16x1xf32>
    %3 = vector.broadcast %2 : vector<16x1xf32> to vector<16x256xf32>
    %4 = arith.mulf %1, %3 : vector<16x256xf32>
    %c0_4 = arith.constant 0 : index
    %c0_5 = arith.constant 0 : index
    %5 = vector.load %arg3[%c0_4, %c0_5] : memref<16x1xf32, #tpu.memory_space<vmem>>, vector<16x1xf32>
    %6 = vector.broadcast %5 : vector<16x1xf32> to vector<16x256xf32>
    %7 = arith.addf %4, %6 : vector<16x256xf32>
    %cst = arith.constant 0.000000e+00 : f32
    %8 = vector.broadcast %cst : f32 to vector<16x256xf32>
    %9 = arith.cmpf oge, %7, %8 : vector<16x256xf32>
    %cst_6 = arith.constant 2.000000e-01 : f32
    %10 = vector.broadcast %cst_6 : f32 to vector<16x256xf32>
    %11 = arith.mulf %10, %7 : vector<16x256xf32>
    %12 = arith.select %9, %7, %11 : vector<16x256xi1>, vector<16x256xf32>
    %13 = vector.extract_strided_slice %12 {offsets = [0, 0], sizes = [4, 256], strides = [1, 1]} : vector<16x256xf32> to vector<4x256xf32>
    %14 = vector.extract_strided_slice %12 {offsets = [4, 0], sizes = [4, 256], strides = [1, 1]} : vector<16x256xf32> to vector<4x256xf32>
    %15 = arith.maximumf %13, %14 : vector<4x256xf32>
    %16 = vector.extract_strided_slice %12 {offsets = [8, 0], sizes = [4, 256], strides = [1, 1]} : vector<16x256xf32> to vector<4x256xf32>
    %17 = arith.maximumf %15, %16 : vector<4x256xf32>
    %18 = vector.extract_strided_slice %12 {offsets = [12, 0], sizes = [4, 256], strides = [1, 1]} : vector<16x256xf32> to vector<4x256xf32>
    %19 = arith.maximumf %17, %18 : vector<4x256xf32>
    %c0_7 = arith.constant 0 : index
    %c0_8 = arith.constant 0 : index
    %c0_9 = arith.constant 0 : index
    %20 = vector.load %arg4[%c0_7, %c0_8, %c0_9] : memref<1x4x256xf32, #tpu.memory_space<vmem>>, vector<1x4x256xf32>
    %21 = vector.shape_cast %20 : vector<1x4x256xf32> to vector<4x256xf32>
    %22 = vector.shape_cast %19 : vector<4x256xf32> to vector<1x4x256xf32>
    tpu.vector_store %arg4[%c0_7, %c0_8, %c0_9], %22 {strides = array<i32>} : memref<1x4x256xf32, #tpu.memory_space<vmem>>, vector<1x4x256xf32>,
    %cst_10 = arith.constant dense<0.000000e+00> : vector<4xf32>
    %23 = vector.multi_reduction <add>, %19, %cst_10 [1] : vector<4x256xf32> to vector<4xf32>
    %24 = vector.shape_cast %23 : vector<4xf32> to vector<4x1xf32>
    %25 = arith.mulf %19, %19 : vector<4x256xf32>
    %cst_11 = arith.constant dense<0.000000e+00> : vector<4xf32>
    %26 = vector.multi_reduction <add>, %25, %cst_11 [1] : vector<4x256xf32> to vector<4xf32>
    %27 = vector.shape_cast %26 : vector<4xf32> to vector<4x1xf32>
    %28 = tpu.concatenate %24, %27 in 1 : vector<4x1xf32>, vector<4x1xf32> -> vector<4x2xf32>
    %c0_12 = arith.constant 0 : index
    %c0_13 = arith.constant 0 : index
    %c0_14 = arith.constant 0 : index
    %29 = vector.load %arg5[%c0_12, %c0_13, %c0_14] : memref<1x4x2xf32, #tpu.memory_space<vmem>>, vector<1x4x2xf32>
    %30 = vector.shape_cast %29 : vector<1x4x2xf32> to vector<4x2xf32>
    %31 = vector.shape_cast %28 : vector<4x2xf32> to vector<1x4x2xf32>
    tpu.vector_store %arg5[%c0_12, %c0_13, %c0_14], %31 {strides = array<i32>} : memref<1x4x2xf32, #tpu.memory_space<vmem>>, vector<1x4x2xf32>,
    return
  }
  func.func @transform_0(%arg0: i32) -> (i32, i32, i32) {
    %c0_i32 = arith.constant 0 : i32
    %c0_i32_0 = arith.constant 0 : i32
    %c0_i32_1 = arith.constant 0 : i32
    return %arg0, %c0_i32, %c0_i32_0 : i32, i32, i32
  }
  func.func @transform_1(%arg0: i32) -> (i32, i32) {
    %c0_i32 = arith.constant 0 : i32
    %c0_i32_0 = arith.constant 0 : i32
    %c0_i32_1 = arith.constant 0 : i32
    return %c0_i32, %c0_i32_0 : i32, i32
  }
  func.func @transform_2(%arg0: i32) -> (i32, i32) {
    %c0_i32 = arith.constant 0 : i32
    %c0_i32_0 = arith.constant 0 : i32
    %c0_i32_1 = arith.constant 0 : i32
    return %c0_i32, %c0_i32_0 : i32, i32
  }
  func.func @transform_3(%arg0: i32) -> (i32, i32, i32) {
    %c0_i32 = arith.constant 0 : i32
    %c0_i32_0 = arith.constant 0 : i32
    %c0_i32_1 = arith.constant 0 : i32
    return %arg0, %c0_i32, %c0_i32_0 : i32, i32, i32
  }
  func.func @transform_4(%arg0: i32) -> (i32, i32, i32) {
    %c0_i32 = arith.constant 0 : i32
    %c0_i32_0 = arith.constant 0 : i32
    %c0_i32_1 = arith.constant 0 : i32
    return %arg0, %c0_i32, %c0_i32_0 : i32, i32, i32
  }
}

module attributes {stable_mosaic.version = 11 : i64} {
  func.func @_bn_act_kernel(%arg0: i32, %arg1: memref<1x4x256xf32, #tpu.memory_space<vmem>>, %arg2: memref<4x1xf32, #tpu.memory_space<vmem>>, %arg3: memref<4x1xf32, #tpu.memory_space<vmem>>, %arg4: memref<1x4x256xf32, #tpu.memory_space<vmem>>) attributes {dimension_semantics = [#tpu.dimension_semantics<parallel>], iteration_bounds = array<i64: 2>, scalar_prefetch = 0 : i64, scratch_operands = 0 : i64, tpu.core_type = #tpu.core_type<tc>, window_params = [{transform_indices = @transform_0, window_bounds = array<i64: 1, 4, 256>}, {pipeline_mode = #tpu.pipeline_mode<synchronous>, transform_indices = @transform_1, window_bounds = array<i64: 4, 1>}, {pipeline_mode = #tpu.pipeline_mode<synchronous>, transform_indices = @transform_2, window_bounds = array<i64: 4, 1>}, {transform_indices = @transform_3, window_bounds = array<i64: 1, 4, 256>}]} {
    %c0 = arith.constant 0 : index
    %c0_0 = arith.constant 0 : index
    %c0_1 = arith.constant 0 : index
    %0 = vector.load %arg1[%c0, %c0_0, %c0_1] : memref<1x4x256xf32, #tpu.memory_space<vmem>>, vector<1x4x256xf32>
    %1 = vector.shape_cast %0 : vector<1x4x256xf32> to vector<4x256xf32>
    %c0_2 = arith.constant 0 : index
    %c0_3 = arith.constant 0 : index
    %2 = vector.load %arg2[%c0_2, %c0_3] : memref<4x1xf32, #tpu.memory_space<vmem>>, vector<4x1xf32>
    %3 = vector.broadcast %2 : vector<4x1xf32> to vector<4x256xf32>
    %4 = arith.mulf %1, %3 : vector<4x256xf32>
    %c0_4 = arith.constant 0 : index
    %c0_5 = arith.constant 0 : index
    %5 = vector.load %arg3[%c0_4, %c0_5] : memref<4x1xf32, #tpu.memory_space<vmem>>, vector<4x1xf32>
    %6 = vector.broadcast %5 : vector<4x1xf32> to vector<4x256xf32>
    %7 = arith.addf %4, %6 : vector<4x256xf32>
    %cst = arith.constant 0.000000e+00 : f32
    %8 = vector.broadcast %cst : f32 to vector<4x256xf32>
    %9 = arith.cmpf oge, %7, %8 : vector<4x256xf32>
    %cst_6 = arith.constant 2.000000e-01 : f32
    %10 = vector.broadcast %cst_6 : f32 to vector<4x256xf32>
    %11 = arith.mulf %10, %7 : vector<4x256xf32>
    %12 = arith.select %9, %7, %11 : vector<4x256xi1>, vector<4x256xf32>
    %c0_7 = arith.constant 0 : index
    %c0_8 = arith.constant 0 : index
    %c0_9 = arith.constant 0 : index
    %13 = vector.load %arg4[%c0_7, %c0_8, %c0_9] : memref<1x4x256xf32, #tpu.memory_space<vmem>>, vector<1x4x256xf32>
    %14 = vector.shape_cast %13 : vector<1x4x256xf32> to vector<4x256xf32>
    %15 = vector.shape_cast %12 : vector<4x256xf32> to vector<1x4x256xf32>
    tpu.vector_store %arg4[%c0_7, %c0_8, %c0_9], %15 {strides = array<i32>} : memref<1x4x256xf32, #tpu.memory_space<vmem>>, vector<1x4x256xf32>,
    return
  }
  func.func @transform_0(%arg0: i32) -> (i32, i32, i32) {
    %c0_i32 = arith.constant 0 : i32
    %c0_i32_0 = arith.constant 0 : i32
    %c0_i32_1 = arith.constant 0 : i32
    return %arg0, %c0_i32, %c0_i32_0 : i32, i32, i32
  }
  func.func @transform_1(%arg0: i32) -> (i32, i32) {
    %c0_i32 = arith.constant 0 : i32
    %c0_i32_0 = arith.constant 0 : i32
    %c0_i32_1 = arith.constant 0 : i32
    return %c0_i32, %c0_i32_0 : i32, i32
  }
  func.func @transform_2(%arg0: i32) -> (i32, i32) {
    %c0_i32 = arith.constant 0 : i32
    %c0_i32_0 = arith.constant 0 : i32
    %c0_i32_1 = arith.constant 0 : i32
    return %c0_i32, %c0_i32_0 : i32, i32
  }
  func.func @transform_3(%arg0: i32) -> (i32, i32, i32) {
    %c0_i32 = arith.constant 0 : i32
    %c0_i32_0 = arith.constant 0 : i32
    %c0_i32_1 = arith.constant 0 : i32
    return %arg0, %c0_i32, %c0_i32_0 : i32, i32, i32
  }
}

</mosaic_0001>

<bundles_post_ra>
// kernel: roto_decoder_skip_block_forward.4
= control target key start
LH: loop header
LB: loop body
LE: loop exit
PB: predicated region body
PF: predicated region fallthrough
CT: control target
= control target key end

     0   :  { %s815_s18 = smov 0   ;;  %s916_s0 = inlined_call_operand.vmem [shape: f32[9,256], index: 0, kind: input, shape index: {}]   ;;  %s917_s1 = inlined_call_operand.vmem [shape: f32[2,2,256], index: 1, kind: input, shape index: {}]   ;;  %s918_s2 = inlined_call_operand.vmem [shape: f32[2,2,256], index: 2, kind: input, shape index: {}]   ;;  %s919_s3 = inlined_call_operand.vmem [shape: f32[16,36], index: 3, kind: input, shape index: {}]   ;;  %s920_s4 = inlined_call_operand.vmem [shape: f32[2,16,256], index: 4, kind: output, shape index: {0}]   ;;  %s921_s5 = inlined_call_operand.vmem [shape: f32[2,16,2], index: 5, kind: output, shape index: {1}]  }
   0x1 LB: > { %s712_s19 = sadd.s32 4294967295, %s773_s18   ;;  %p716_p0 = scmp.ge.s32.totalorder %s773_s18, 1  ;;  %s773_s18 = sphi %s815_s18, %s16_s18  }
   0x2   : > { %p200_p1 = scmp.lt.s32.totalorder %s773_s18, 3 }
   0x4   : > { %p201_p2 = pnand %p716_p0, %p200_p1 }
   0x5   : > { %p238_p3 = scmp.lt.s32.totalorder (!%p201_p2), %s712_s19, 1  ;;  %s776_s6 = smov (!%p201_p2), 111  }
   0x6   : > { %204 = sbr.rel (%p201_p2) target bundleno = 515 (0x203), region = 36  ;;  %s777_s7 = smov (!%p201_p2), 112  }
   0x7   : > { %s778_s8 = smov (!%p201_p2), 127   ;;  %s779_s9 = smov (!%p201_p2), 113  }
   0x8   : > { %s780_s10 = smov (!%p201_p2), 1   ;;  %s781_s11 = smov (!%p201_p2), 16  }
   0x9   : > { %s783_s12 = smov (!%p201_p2), 15   ;;  %s784_s13 = smov (!%p201_p2), 17  }
   0xb   : > { %v280_v0 = vlaneseq  ;;  %v775_v1 = vmov 1983009808   ;;  %s923_s19 = smov (!%p238_p3, %s712_s19), 1  ;;  %vm287_vm0 = vcmask 1041408   ;;  %v839_v9 = vld [vmem:[%s916_s0] sm:$0xff]  ;;  %v844_v12 = vld [vmem:[%s916_s0 + $0x8] sm:$0xff] }
   0xc   : > { %v278_v2 = vunpack.c.l.s4 %v775_v1  ;;  %s734_s20 = sshll.u32 %s923_s19, 2  ;;  %v782_v20 = vmov 0.0   ;;  %vm446_vm1 = vcmask 908288   ;;  %v726_v24 = vld [vmem:[%s916_s0 + $0x10] ss:$0 sm:$0xff]  ;;  %vm486_vm2 = vcmask 1043456  }
   0xd   : > { %v825_v3 = vshrl.u32 %v280_v0, 7  ;;  %s242_s23 = scalar_lea.vmem %s917_s1, %s734_s20  ;;  %s247_s26 = scalar_lea.vmem %s918_s2, %s734_s20  ;;  %574 = vmatprep.mubr.f32.mxu0 %v782_v20  ;;  %580 = vmatprep.mubr.f32.mxu1 %v782_v20  ;;  %v727_v25 = vld [vmem:[%s916_s0 + $0x18] ss:$0 sm:$0xff]  ;;  %vm386_vm3 = vcmask 1039360   ;;  %vm406_vm4 = vcmask 924672   ;;  %vm426_vm5 = vcmask 916480  }
   0xe   : > { %v279_v4 = vunpack.c.0.s8 %v278_v2  ;;  %v766_v6 = vld [vmem:[%s247_s26] ss:$0 sps:$4 sm:$0xff]   ;;  %vm357_vm6 = vcmask 7168   ;;  %vm317_vm7 = vcmask 130048   ;;  %vm337_vm8 = vcmask 121856   ;;  %s736_s24 = sshll.u32 %s923_s19, 5 }
   0xf   : > { %v374_v7 = vsub.s32 4, %v825_v3  ;;  %v725_v8 = vld.sshfl [vmem:[%s242_s23] sm:$0x33 pattern:$0x76325410]  ;;  %v394_v23 = vsub.s32 5, %v825_v3  ;;  %s252_s27 = scalar_lea.vmem %s920_s4, %s736_s24 }
  0x10   : > { %v282_v5 = vsub.s32 %v279_v4, %v825_v3  ;;  %v272_v11 = vcombine.high %v725_v8, %v725_v8  ;;  %v434_v34 = vsub.s32 7, %v825_v3  ;;  %v414_v35 = vsub.s32 6, %v825_v3  ;;  %s737_s28 = sshll.u32 %s923_s19, 4 }
  0x11   : > { %v375_v13 = vrot.slane %v839_v9, %v374_v7  ;;  %v379_v14 = vrot.slane %v844_v12, %v374_v7  ;;  %v395_v30 = vrot.slane %v839_v9, %v394_v23  ;;  %v399_v31 = vrot.slane %v844_v12, %v394_v23 }
  0x12   : > { %v283_v10 = vrot.slane %v766_v6, %v282_v5  ;;  %v435_v42 = vrot.slane %v839_v9, %v434_v34  ;;  %v439_v43 = vrot.slane %v844_v12, %v434_v34  ;;  %v415_v44 = vrot.slane %v839_v9, %v414_v35 }
  0x13   : > { %v419_v47 = vrot.slane %v844_v12, %v414_v35  ;;  %v364_v50 = vsub.s32 3, %v825_v3  ;;  %v324_v4 = vsub.s32 1, %v825_v3  ;;  %v344_v5 = vsub.s32 2, %v825_v3 }
  0x14   : > { %v288_v15 = vsel %vm287_vm0, %v725_v8, %v283_v10  ;;  %v284_v16 = vcombine.high %v283_v10, %v283_v10  ;;  %vm297_vm9 = vcmask 138240   ;;  %vm497_vm10 = vcmask 293888  }
  0x15   : > { %442 = vrot.lane.b32.xlu1 %v288_v15, %s776_s6  ;;  %422 = vrot.lane.b32.xlu0 %v288_v15, %s777_s7  ;;  %v848_v17 = vmul.f32 %v375_v13, %v288_v15  ;;  %v365_v1 = vrot.slane %v839_v9, %v364_v50  ;;  %v369_v2 = vrot.slane %v844_v12, %v364_v50  ;;  %vm609_vm11 = vcmask 15360  }
  0x16   : > { %v289_v18 = vsel %vm287_vm0, %v272_v11, %v284_v16  ;;  %v349_v20 = vrot.slane %v844_v12, %v344_v5 }
  0x17   : > { %v850_v19 = vmul.f32 %v379_v14, %v289_v18  ;;  %v304_v14 = vsub.s32 0, %v825_v3 }
  0x19   : > { %382 = vrot.lane.b32.xlu0 %v288_v15, %s778_s8  ;;  %444 = vrot.lane.b32.xlu1 %v289_v18, %s776_s6  ;;  %v305_v3 = vrot.slane %v839_v9, %v304_v14  ;;  %s257_s6 = scalar_lea.vmem %s921_s5, %s737_s28 }
  0x1d   : > { %402 = vrot.lane.b32.xlu0 %v288_v15, %s779_s9  ;;  %384 = vrot.lane.b32.xlu1 %v289_v18, %s778_s8 }
  0x21   : > { %404 = vrot.lane.b32.xlu1 %v289_v18, %s779_s9  ;;  %424 = vrot.lane.b32.xlu0 %v289_v18, %s777_s7 }
  0x25   : > { %355 = vrot.lane.b32.xlu1 %v288_v15, %s780_s10  ;;  %352 = vrot.lane.b32.xlu0 %v289_v18, %s780_s10 }
  0x29   : > { %315 = vrot.lane.b32.xlu1 %v288_v15, %s781_s11  ;;  %312 = vrot.lane.b32.xlu0 %v289_v18, %s781_s11 }
  0x2d   : > { %335 = vrot.lane.b32.xlu1 %v288_v15, %s783_s12  ;;  %332 = vrot.lane.b32.xlu0 %v289_v18, %s783_s12 }
  0x31   : > { %295 = vrot.lane.b32.xlu1 %v288_v15, %s784_s13  ;;  %291 = vrot.lane.b32.xlu0 %v289_v18, %s784_s13  ;;  %v329_v18 = vrot.slane %v844_v12, %v324_v4 }
  0x87   : > { %v443_v21 = vpop.permute.xlu1 %442  ;;  %v423_v22 = vpop.permute.xlu0 %422 }
  0x8b   : > { %v383_v26 = vpop.permute.xlu0 %382  ;;  %v445_v27 = vpop.permute.xlu1 %444 }
  0x8c   : > { %v447_v28 = vsel %vm446_vm1, %v443_v21, %v445_v27  ;;  %v451_v29 = vsel %vm446_vm1, %v445_v27, %v443_v21 }
  0x8d   : > { %v460_v32 = vmul.f32 %v726_v24, %v447_v28  ;;  %v461_v33 = vmul.f32 %v727_v25, %v451_v29  ;;  %v309_v25 = vrot.slane %v844_v12, %v304_v14 }
  0x8f   : > { %v403_v36 = vpop.permute.xlu0 %402  ;;  %728 = vmatprep.subr.msk.mxu0 %vm486_vm2, %v461_v33  ;;  %738 = vmatprep.subr.msk.mxu1 %vm486_vm2, %v461_v33  ;;  %v385_v37 = vpop.permute.xlu1 %384 }
  0x90   : > { %v387_v38 = vsel %vm386_vm3, %v383_v26, %v385_v37  ;;  %v391_v39 = vsel %vm386_vm3, %v385_v37, %v383_v26  ;;  %729 = vmatpush1.msk.msra.mxu0 %vm486_vm2, %v460_v32  ;;  %743 = vmatpush1.msk.msra.mxu1 %vm486_vm2, %v460_v32 }
  0x91   : > { %v400_v40 = vmul.f32 %v395_v30, %v387_v38  ;;  %v401_v41 = vmul.f32 %v399_v31, %v391_v39 }
  0x93   : > { %v476_v45 = vrot.slane %v400_v40, 4  ;;  %v477_v46 = vrot.slane %v401_v41, 4  ;;  %v405_v48 = vpop.permute.xlu1 %404  ;;  %v425_v49 = vpop.permute.xlu0 %424 }
  0x94   : > { %v407_v51 = vsel %vm406_vm4, %v403_v36, %v405_v48  ;;  %v411_v52 = vsel %vm406_vm4, %v405_v48, %v403_v36  ;;  %v427_v53 = vsel %vm426_vm5, %v423_v22, %v425_v49  ;;  %v431_v54 = vsel %vm426_vm5, %v425_v49, %v423_v22 }
  0x95   : > { %v440_v55 = vmul.f32 %v435_v42, %v427_v53  ;;  %v441_v56 = vmul.f32 %v439_v43, %v431_v54  ;;  %v492_v57 = vsel %vm486_vm2, %v850_v19, %v477_v46  ;;  %v491_v58 = vsel %vm486_vm2, %v848_v17, %v476_v45  ;;  %v496_v45 = vld [vmem:[%s919_s3 + $0x8] sm:$0xff] }
  0x96   : > { %v420_v59 = vmul.f32 %v415_v44, %v407_v51  ;;  %v421_v60 = vmul.f32 %v419_v47, %v411_v52  ;;  %v325_v17 = vrot.slane %v839_v9, %v324_v4  ;;  %v345_v19 = vrot.slane %v839_v9, %v344_v5  ;;  %v495_v44 = vld [vmem:[%s919_s3] sm:$0xff] }
  0x97   : > { %v482_v61 = vrot.slane %v440_v55, 4  ;;  %v483_v62 = vrot.slane %v441_v56, 4  ;;  %v356_v63 = vpop.permute.xlu1 %355  ;;  %v353_v0 = vpop.permute.xlu0 %352 }
  0x98   : > { %v358_v6 = vsel %vm357_vm6, %v356_v63, %v353_v0  ;;  %v361_v7 = vsel %vm357_vm6, %v353_v0, %v356_v63 }
  0x99   : > { %v494_v8 = vsel %vm486_vm2, %v421_v60, %v483_v62  ;;  %v493_v10 = vsel %vm486_vm2, %v420_v59, %v482_v61  ;;  %v370_v15 = vmul.f32 %v365_v1, %v361_v7  ;;  %v371_v16 = vmul.f32 %v369_v2, %v358_v6 }
  0x9a   : > { %534 = vmatprep.subr.mxu0 %v494_v8  ;;  %739 = vmatprep.subr.mxu1 %v494_v8 }
  0x9b   : > { %v316_v11 = vpop.permute.xlu1 %315  ;;  %535 = vmatpush1.msra.mxu0 %v493_v10  ;;  %744 = vmatpush1.msra.mxu1 %v493_v10  ;;  %v313_v13 = vpop.permute.xlu0 %312  ;;  %v470_v26 = vrot.slane %v370_v15, 4  ;;  %v471_v27 = vrot.slane %v371_v16, 4 }
  0x9c   : > { %536 = vmatprep.subr.mxu0 %v492_v57  ;;  %740 = vmatprep.subr.mxu1 %v492_v57  ;;  %v318_v21 = vsel %vm317_vm7, %v316_v11, %v313_v13  ;;  %v321_v22 = vsel %vm317_vm7, %v313_v13, %v316_v11 }
  0x9d   : > { %537 = vmatpush1.msra.mxu0 %v491_v58  ;;  %745 = vmatpush1.msra.mxu1 %v491_v58  ;;  %v330_v30 = vmul.f32 %v325_v17, %v321_v22  ;;  %v331_v31 = vmul.f32 %v329_v18, %v318_v21 }
  0x9f   : > { %v336_v23 = vpop.permute.xlu1 %335  ;;  %v333_v24 = vpop.permute.xlu0 %332  ;;  %v464_v12 = vrot.slane %v330_v30, 4  ;;  %v465_v39 = vrot.slane %v331_v31, 4 }
  0xa0   : > { %v338_v28 = vsel %vm337_vm8, %v336_v23, %v333_v24  ;;  %v341_v29 = vsel %vm337_vm8, %v333_v24, %v336_v23 }
  0xa1   : > { %v350_v32 = vmul.f32 %v345_v19, %v341_v29  ;;  %v351_v33 = vmul.f32 %v349_v20, %v338_v28 }
  0xa3   : > { %v296_v34 = vpop.permute.xlu1 %295  ;;  %v292_v35 = vpop.permute.xlu0 %291  ;;  %v490_v36 = vsel %vm486_vm2, %v351_v33, %v471_v27  ;;  %v489_v37 = vsel %vm486_vm2, %v350_v32, %v470_v26 }
  0xa4   : > { %v298_v38 = vsel %vm297_vm9, %v296_v34, %v292_v35  ;;  %v301_v9 = vsel %vm297_vm9, %v292_v35, %v296_v34  ;;  %538 = vmatprep.subr.mxu0 %v490_v36  ;;  %741 = vmatprep.subr.mxu1 %v490_v36 }
  0xa5   : > { %v310_v40 = vmul.f32 %v305_v3, %v301_v9  ;;  %v311_v41 = vmul.f32 %v309_v25, %v298_v38  ;;  %539 = vmatpush1.msra.mxu0 %v489_v37  ;;  %746 = vmatpush1.msra.mxu1 %v489_v37 }
  0xa7   : > { %v488_v42 = vsel %vm486_vm2, %v311_v41, %v465_v39  ;;  %v487_v43 = vsel %vm486_vm2, %v310_v40, %v464_v12 }
  0xa8   : > { %540 = vmatprep.subr.mxu0 %v488_v42  ;;  %742 = vmatprep.subr.mxu1 %v488_v42 }
  0xa9   : > { %541 = vmatpush1.msra.mxu0 %v487_v43  ;;  %747 = vmatpush1.msra.mxu1 %v487_v43 }
  0xaa   : > { %730 = vmatmul.mubr.msk.f32.vlgmr.msra.gmra.mxu0 %vm497_vm10, %v495_v44  ;;  %731 = vmatmul.mubr.msk.f32.vlgmr.msra.gmra.mxu1 %vm497_vm10, %v496_v45 }
 0x16a   : > { %v576_v46 = vpop.f32.mrf.mxu0  ;;  %v582_v47 = vpop.f32.mrf.mxu1 }
 0x16b   : > { %587 = vst [vmem:[%s252_s27] sm:$0xff] %v576_v46  ;;  %589 = vst [vmem:[%s252_s27 + $0x10] sm:$0xff] %v582_v47  ;;  %v597_v53 = vmul.f32 %v576_v46, %v576_v46  ;;  %v599_v56 = vmul.f32 %v582_v47, %v582_v47 }
 0x16c   : > { %v578_v48 = vpop.f32.mrf.mxu0  ;;  %v584_v49 = vpop.f32.mrf.mxu1 }
 0x16d   : > { %588 = vst [vmem:[%s252_s27 + $0x8] sm:$0xff] %v578_v48  ;;  %v598_v50 = vmul.f32 %v578_v48, %v578_v48  ;;  %v591_v51 = vadd.f32 %v578_v48, %v576_v46  ;;  %590 = vst [vmem:[%s252_s27 + $0x18] sm:$0xff] %v584_v49  ;;  %v594_v52 = vadd.f32 %v584_v49, %v582_v47 }
 0x16e   : > { %v600_v54 = vmul.f32 %v584_v49, %v584_v49 }
 0x16f   : > { %592 = vadd.xlane.f32.xlu0 %v591_v51  ;;  %595 = vadd.xlane.f32.xlu1 %v594_v52  ;;  %v601_v55 = vadd.f32 %v598_v50, %v597_v53 }
 0x170   : > { %v604_v57 = vadd.f32 %v600_v54, %v599_v56 }
 0x173   : > { %602 = vadd.xlane.f32.xlu0 %v601_v55 }
 0x177   : > { %605 = vadd.xlane.f32.xlu0 %v604_v57 }
 0x1f8   : > { %v593_v58 = vpop.xlane.xlu0 %592  ;;  %v596_v61 = vpop.xlane.xlu1 %595 }
 0x1fc   : > { %v603_v59 = vpop.xlane.xlu0 %602 }
 0x1fd   : > { %v607_v60 = vsel %vm357_vm6, %v593_v58, %v603_v59 }
 0x1fe   : > { %610 = vst.msk [vmem:[%s257_s6] sm:$0xff] %vm609_vm11, %v607_v60 }
 0x200   : > { %v606_v62 = vpop.xlane.xlu0 %605 }
 0x201   : > { %v608_v63 = vsel %vm357_vm6, %v596_v61, %v606_v62 }
 0x202   : > { %611 = vst.msk [vmem:[%s257_s6 + $0x8] sm:$0xff] %vm609_vm11, %v608_v63 }
 0x203 PF: > { %s16_s18 = sadd.s32 1, %s773_s18  }
 0x204   : > { %p13_p4 = scmp.ge.s32.totalorder %s16_s18, 4  }
 0x206   :  { %15 = sbr.rel (!%p13_p4) target bundleno = 1 (0x1), region = 81 }

// kernel: roto_decoder_skip_block_forward.6
= control target key start
LH: loop header
LB: loop body
LE: loop exit
PB: predicated region body
PF: predicated region fallthrough
CT: control target
= control target key end

     0   :  { %s442_s15 = smov 0   ;;  %s479_s0 = inlined_call_operand.vmem [shape: f32[2,16,256], index: 0, kind: input, shape index: {}]   ;;  %s480_s1 = inlined_call_operand.vmem [shape: f32[16,1], index: 1, kind: input, shape index: {}]   ;;  %s481_s2 = inlined_call_operand.vmem [shape: f32[16,1], index: 2, kind: input, shape index: {}]   ;;  %s482_s3 = inlined_call_operand.vmem [shape: f32[2,4,256], index: 3, kind: output, shape index: {0}]   ;;  %s483_s4 = inlined_call_operand.vmem [shape: f32[2,4,2], index: 4, kind: output, shape index: {1}]  }
   0x1 LB: > { %s383_s16 = sadd.s32 4294967295, %s414_s15   ;;  %p387_p0 = scmp.ge.s32.totalorder %s414_s15, 1  ;;  %s414_s15 = sphi %s442_s15, %s15_s15  }
   0x2   : > { %p165_p1 = scmp.lt.s32.totalorder %s414_s15, 3 }
   0x4   : > { %p166_p2 = pnand %p387_p0, %p165_p1 }
   0x5   : > { %p195_p3 = scmp.lt.s32.totalorder (!%p166_p2), %s383_s16, 1 }
   0x6   : > { %169 = sbr.rel (%p166_p2) target bundleno = 301 (0x12d), region = 32 }
   0xb   : > { %v214_v0 = vld [vmem:[%s480_s1 + $0x8] sm:$0xff]  ;;  %v213_v1 = vld [vmem:[%s480_s1] sm:$0xff]  ;;  %v416_v2 = vmov 0   ;;  %s485_s16 = smov (!%p195_p3, %s383_s16), 1  ;;  %vm280_vm4 = vcmask 1043456   ;;  %vm293_vm5 = vcmask 7168  }
   0xc   : > { %407 = vset.pattern.permute.xlu1 %v416_v2  ;;  %406 = vset.pattern.permute.xlu0 %v416_v2  ;;  %v230_v3 = vld [vmem:[%s481_s2 + $0x8] sm:$0xff]  ;;  %v229_v4 = vld [vmem:[%s481_s2] sm:$0xff]  ;;  %s395_s25 = sshll.u32 %s485_s16, 5  ;;  %s396_s29 = sshll.u32 %s485_s16, 3  ;;  %vm295_vm6 = vcmask 11264  }
   0xd   : > { %222 = vperm.xlu1 %407, %v214_v0   ;;  %217 = vperm.xlu0 %406, %v213_v1   ;;  %s199_s28 = scalar_lea.vmem %s479_s0, %s395_s25  ;;  %s204_s6 = scalar_lea.vmem %s482_s3, %s396_s29 }
   0xe   : > { %v211_v5 = vld [vmem:[%s199_s28 + $0x10] sm:$0xff]  ;;  %v212_v6 = vld [vmem:[%s199_s28 + $0x18] sm:$0xff]  ;;  %v209_v9 = vld [vmem:[%s199_s28] sm:$0xff]  ;;  %s392_s7 = sshll.u32 %s485_s16, 2 }
   0xf   : > { %v210_v10 = vld [vmem:[%s199_s28 + $0x8] sm:$0xff]  ;;  %s208_s10 = scalar_lea.vmem %s483_s4, %s392_s7 }
  0x11   : > { %238 = vperm.xlu1 %407, %v230_v3   ;;  %233 = vperm.xlu0 %406, %v229_v4  }
  0x88   : > { %v223_v7 = vpop.permute.xlu1 %222  ;;  %v218_v8 = vpop.permute.xlu0 %217 }
  0x89   : > { %v227_v11 = vmul.f32 %v223_v7, %v211_v5  ;;  %v228_v12 = vmul.f32 %v223_v7, %v212_v6  ;;  %v225_v13 = vmul.f32 %v218_v8, %v209_v9  ;;  %v226_v14 = vmul.f32 %v218_v8, %v210_v10 }
  0x8c   : > { %v239_v15 = vpop.permute.xlu1 %238  ;;  %v234_v16 = vpop.permute.xlu0 %233 }
  0x8d   : > { %v243_v17 = vadd.f32 %v239_v15, %v227_v11  ;;  %v244_v18 = vadd.f32 %v239_v15, %v228_v12  ;;  %v241_v19 = vadd.f32 %v234_v16, %v225_v13  ;;  %v242_v20 = vadd.f32 %v234_v16, %v226_v14 }
  0x8f   : > { %v251_v21 = vmul.f32 0.2, %v243_v17  ;;  %v252_v22 = vmul.f32 0.2, %v244_v18  ;;  %vm245_vm0 = vcmp.ge.f32.partialorder %v241_v19, 0.0  ;;  %vm246_vm1 = vcmp.ge.f32.partialorder %v242_v20, 0.0 }
  0x90   : > { %v249_v23 = vmul.f32 0.2, %v241_v19  ;;  %v250_v24 = vmul.f32 0.2, %v242_v20  ;;  %vm247_vm2 = vcmp.ge.f32.partialorder %v243_v17, 0.0  ;;  %vm248_vm3 = vcmp.ge.f32.partialorder %v244_v18, 0.0 }
  0x91   : > { %v255_v29 = vsel %vm247_vm2, %v243_v17, %v251_v21  ;;  %v256_v30 = vsel %vm248_vm3, %v244_v18, %v252_v22 }
  0x92   : > { %v253_v25 = vsel %vm245_vm0, %v241_v19, %v249_v23  ;;  %v254_v26 = vsel %vm246_vm1, %v242_v20, %v250_v24  ;;  %v269_v33 = vrot.slane %v255_v29, 4  ;;  %v270_v34 = vrot.slane %v256_v30, 4 }
  0x93   : > { %v259_v27 = vrot.slane %v253_v25, 4  ;;  %v260_v28 = vrot.slane %v254_v26, 4 }
  0x95   : > { %v263_v31 = vmax.f32 %v253_v25, %v259_v27  ;;  %v264_v32 = vmax.f32 %v254_v26, %v260_v28 }
  0x97   : > { %v265_v35 = vmax.f32 %v263_v31, %v255_v29  ;;  %v266_v36 = vmax.f32 %v264_v32, %v256_v30 }
  0x99   : > { %v273_v37 = vmax.f32 %v265_v35, %v269_v33  ;;  %v274_v38 = vmax.f32 %v266_v36, %v270_v34 }
  0x9b   : > { %v281_v39 = vsel %vm280_vm4, %v273_v37, 0.0  ;;  %v282_v40 = vsel %vm280_vm4, %v274_v38, 0.0  ;;  %v277_v41 = vcombine.low %v273_v37, %v274_v38  ;;  %v286_v42 = vmul.f32 %v273_v37, %v273_v37 }
  0x9c   : > { %v283_v43 = vadd.f32 %v282_v40, %v281_v39  ;;  %v287_v44 = vmul.f32 %v274_v38, %v274_v38 }
  0x9d   : > { %279 = vst [vmem:[%s204_s6] sm:$0xff] %v277_v41  ;;  %v288_v45 = vsel %vm280_vm4, %v286_v42, 0.0 }
  0x9e   : > { %284 = vadd.xlane.f32.xlu0 %v283_v43  ;;  %v289_v46 = vsel %vm280_vm4, %v287_v44, 0.0 }
  0x9f   : > { %v290_v47 = vadd.f32 %v289_v46, %v288_v45 }
  0xa1   : > { %291 = vadd.xlane.f32.xlu1 %v290_v47 }
 0x127   : > { %v285_v48 = vpop.xlane.xlu0 %284 }
 0x12a   : > { %v292_v49 = vpop.xlane.xlu1 %291 }
 0x12b   : > { %v294_v50 = vsel %vm293_vm5, %v285_v48, %v292_v49 }
 0x12c   : > { %296 = vst.msk [vmem:[%s208_s10] sm:$0xf] %vm295_vm6, %v294_v50 }
 0x12d PF: > { %s15_s15 = sadd.s32 1, %s414_s15  }
 0x12e   : > { %p12_p4 = scmp.ge.s32.totalorder %s15_s15, 4  }
 0x130   :  { %14 = sbr.rel (!%p12_p4) target bundleno = 1 (0x1), region = 74 }

// kernel: roto_decoder_skip_block_forward.5
= control target key start
LH: loop header
LB: loop body
LE: loop exit
PB: predicated region body
PF: predicated region fallthrough
CT: control target
= control target key end

     0   :  { %s908_s21 = smov 0   ;;  %s1082_s0 = inlined_call_operand.vmem [shape: f32[9,256], index: 0, kind: input, shape index: {}]   ;;  %s1083_s1 = inlined_call_operand.vmem [shape: f32[2,16,256], index: 1, kind: input, shape index: {}]   ;;  %s1084_s2 = inlined_call_operand.vmem [shape: f32[16,1], index: 2, kind: input, shape index: {}]   ;;  %s1085_s3 = inlined_call_operand.vmem [shape: f32[16,1], index: 3, kind: input, shape index: {}]   ;;  %s1086_s4 = inlined_call_operand.vmem [shape: f32[16,144], index: 4, kind: input, shape index: {}]   ;;  %s1087_s5 = inlined_call_operand.vmem [shape: f32[2,16,256], index: 5, kind: output, shape index: {0}]   ;;  %s1088_s6 = inlined_call_operand.vmem [shape: f32[2,16,2], index: 6, kind: output, shape index: {1}]  }
   0x1 LB: > { %s781_s22 = sadd.s32 4294967295, %s862_s21   ;;  %p785_p0 = scmp.ge.s32.totalorder %s862_s21, 1  ;;  %s862_s21 = sphi %s908_s21, %s17_s21  }
   0x2   : > { %p215_p1 = scmp.lt.s32.totalorder %s862_s21, 3 }
   0x4   : > { %p216_p2 = pnand %p785_p0, %p215_p1 }
   0x5   : > { %p250_p3 = scmp.lt.s32.totalorder (!%p216_p2), %s781_s22, 1  ;;  %s865_s11 = smov (!%p216_p2), 112  }
   0x6   : > { %219 = sbr.rel (%p216_p2) target bundleno = 670 (0x29e), region = 40  ;;  %s866_s12 = smov (!%p216_p2), 113  }
   0x7   : > { %s867_s13 = smov (!%p216_p2), 127   ;;  %s868_s14 = smov (!%p216_p2), 1  }
   0x8   : > { %s869_s15 = smov (!%p216_p2), 15   ;;  %s870_s16 = smov (!%p216_p2), 16  }
   0x9   : > { %s871_s17 = smov (!%p216_p2), 17   ;;  %s872_s24 = smov (!%p216_p2), 111  }
   0xb   : > { %v290_v0 = vld [vmem:[%s1085_s3 + $0x8] sm:$0xff]  ;;  %v864_v2 = vmov 0   ;;  %v289_v3 = vld [vmem:[%s1085_s3] sm:$0xff]  ;;  %s1090_s22 = smov (!%p250_p3, %s781_s22), 1  ;;  %vm362_vm4 = vcmask 130048   ;;  %v584_v30 = vld [vmem:[%s1086_s4 + $0x18] sm:$0xff]  ;;  %v340_v31 = vlaneseq }
   0xc   : > { %v274_v1 = vld [vmem:[%s1084_s2 + $0x8] sm:$0xff]  ;;  %855 = vset.pattern.permute.xlu1 %v864_v2  ;;  %854 = vset.pattern.permute.xlu0 %v864_v2  ;;  %v273_v4 = vld [vmem:[%s1084_s2] sm:$0xff]  ;;  %s798_s7 = sshll.u32 %s1090_s22, 5  ;;  %vm527_vm5 = vcmask 916480   ;;  %vm496_vm6 = vcmask 924672   ;;  %vm465_vm7 = vcmask 1039360  }
   0xd   : > { %298 = vperm.xlu1 %855, %v290_v0   ;;  %282 = vperm.xlu0 %854, %v274_v1   ;;  %s254_s10 = scalar_lea.vmem %s1083_s1, %s798_s7  ;;  %v582_v29 = vld [vmem:[%s1086_s4 + $0x8] sm:$0xff]  ;;  %v984_v32 = vshrl.u32 %v340_v31, 7  ;;  %v995_v35 = vld [vmem:[%s1082_s0] sm:$0xff]  ;;  %vm424_vm8 = vcmask 7168   ;;  %vm393_vm9 = vcmask 121856   ;;  %vm331_vm10 = vcmask 138240  }
   0xe   : > { %v271_v5 = vld [vmem:[%s254_s10 + $0x10] sm:$0xff]  ;;  %v272_v6 = vld [vmem:[%s254_s10 + $0x18] sm:$0xff]  ;;  %v269_v13 = vld [vmem:[%s254_s10] sm:$0xff]  ;;  %794 = vmatprep.mubr.msk.f32.mxu0 %vm362_vm4, %v582_v29  ;;  %795 = vmatprep.mubr.msk.f32.mxu1 %vm362_vm4, %v584_v30  ;;  %vm558_vm11 = vcmask 908288   ;;  %vm690_vm12 = vcmask 15360  }
   0xf   : > { %v270_v14 = vld [vmem:[%s254_s10 + $0x8] sm:$0xff]  ;;  %v540_v33 = vsub.s32 7, %v984_v32  ;;  %v509_v44 = vsub.s32 6, %v984_v32  ;;  %v478_v59 = vsub.s32 5, %v984_v32 }
  0x10   : > { %v990_v34 = vld [vmem:[%s1082_s0 + $0x8] sm:$0xff] }
  0x11   : > { %293 = vperm.xlu1 %855, %v289_v3   ;;  %277 = vperm.xlu0 %854, %v273_v4   ;;  %v545_v36 = vrot.slane %v990_v34, %v540_v33  ;;  %v541_v37 = vrot.slane %v995_v35, %v540_v33  ;;  %v510_v51 = vrot.slane %v995_v35, %v509_v44 }
  0x12   : > { %v514_v52 = vrot.slane %v990_v34, %v509_v44  ;;  %v479_v2 = vrot.slane %v995_v35, %v478_v59  ;;  %v483_v3 = vrot.slane %v990_v34, %v478_v59 }
  0x88   : > { %v283_v7 = vpop.permute.xlu0 %282  ;;  %v299_v8 = vpop.permute.xlu1 %298 }
  0x89   : > { %v287_v9 = vmul.f32 %v283_v7, %v271_v5  ;;  %v288_v10 = vmul.f32 %v283_v7, %v272_v6  ;;  %v447_v6 = vsub.s32 4, %v984_v32 }
  0x8b   : > { %v303_v11 = vadd.f32 %v299_v8, %v287_v9  ;;  %v304_v12 = vadd.f32 %v299_v8, %v288_v10 }
  0x8c   : > { %v278_v15 = vpop.permute.xlu0 %277  ;;  %v294_v22 = vpop.permute.xlu1 %293 }
  0x8d   : > { %vm307_vm0 = vcmp.ge.f32.partialorder %v303_v11, 0.0  ;;  %vm308_vm1 = vcmp.ge.f32.partialorder %v304_v12, 0.0  ;;  %v311_v16 = vmul.f32 0.2, %v303_v11  ;;  %v312_v17 = vmul.f32 0.2, %v304_v12 }
  0x8e   : > { %v285_v18 = vmul.f32 %v278_v15, %v269_v13  ;;  %v286_v19 = vmul.f32 %v278_v15, %v270_v14  ;;  %v435_v13 = vsub.s32 3, %v984_v32  ;;  %v452_v14 = vrot.slane %v990_v34, %v447_v6 }
  0x8f   : > { %v936_v20 = vsel %vm307_vm0, %v303_v11, %v311_v16  ;;  %v938_v21 = vsel %vm308_vm1, %v304_v12, %v312_v17  ;;  %v448_v17 = vrot.slane %v995_v35, %v447_v6 }
  0x90   : > { %v301_v23 = vadd.f32 %v294_v22, %v285_v18  ;;  %v302_v24 = vadd.f32 %v294_v22, %v286_v19  ;;  %525 = vrot.lane.b32.xlu1 %v938_v21, %s865_s11  ;;  %523 = vrot.lane.b32.xlu0 %v936_v20, %s865_s11  ;;  %v436_v29 = vrot.slane %v995_v35, %v435_v13 }
  0x91   : > { %v455_v31 = vmul.f32 %v448_v17, %v936_v20 }
  0x92   : > { %vm305_vm2 = vcmp.ge.f32.partialorder %v301_v23, 0.0  ;;  %vm306_vm3 = vcmp.ge.f32.partialorder %v302_v24, 0.0  ;;  %v309_v25 = vmul.f32 0.2, %v301_v23  ;;  %v310_v26 = vmul.f32 0.2, %v302_v24 }
  0x94   : > { %v942_v27 = vsel %vm305_vm2, %v301_v23, %v309_v25  ;;  %v944_v28 = vsel %vm306_vm3, %v302_v24, %v310_v26  ;;  %v440_v23 = vrot.slane %v990_v34, %v435_v13  ;;  %v456_v25 = vmul.f32 %v452_v14, %v938_v21 }
  0x95   : > { %521 = vrot.lane.b32.xlu1 %v944_v28, %s865_s11  ;;  %519 = vrot.lane.b32.xlu0 %v942_v27, %s865_s11  ;;  %v404_v26 = vsub.s32 2, %v984_v32 }
  0x99   : > { %494 = vrot.lane.b32.xlu1 %v938_v21, %s866_s12  ;;  %492 = vrot.lane.b32.xlu0 %v936_v20, %s866_s12 }
  0x9d   : > { %490 = vrot.lane.b32.xlu1 %v944_v28, %s866_s12  ;;  %488 = vrot.lane.b32.xlu0 %v942_v27, %s866_s12 }
  0xa1   : > { %463 = vrot.lane.b32.xlu1 %v938_v21, %s867_s13  ;;  %461 = vrot.lane.b32.xlu0 %v936_v20, %s867_s13 }
  0xa5   : > { %459 = vrot.lane.b32.xlu1 %v944_v28, %s867_s13  ;;  %457 = vrot.lane.b32.xlu0 %v942_v27, %s867_s13 }
  0xa9   : > { %422 = vrot.lane.b32.xlu1 %v936_v20, %s868_s14  ;;  %416 = vrot.lane.b32.xlu0 %v938_v21, %s868_s14 }
  0xad   : > { %420 = vrot.lane.b32.xlu1 %v942_v27, %s868_s14  ;;  %414 = vrot.lane.b32.xlu0 %v944_v28, %s868_s14 }
  0xb1   : > { %391 = vrot.lane.b32.xlu1 %v936_v20, %s869_s15  ;;  %385 = vrot.lane.b32.xlu0 %v938_v21, %s869_s15 }
  0xb5   : > { %389 = vrot.lane.b32.xlu1 %v942_v27, %s869_s15  ;;  %383 = vrot.lane.b32.xlu0 %v944_v28, %s869_s15 }
  0xb9   : > { %360 = vrot.lane.b32.xlu1 %v936_v20, %s870_s16  ;;  %354 = vrot.lane.b32.xlu0 %v938_v21, %s870_s16 }
  0xbd   : > { %358 = vrot.lane.b32.xlu1 %v942_v27, %s870_s16  ;;  %352 = vrot.lane.b32.xlu0 %v944_v28, %s870_s16  ;;  %s259_s16 = scalar_lea.vmem %s1087_s5, %s798_s7  ;;  %s800_s7 = sshll.u32 %s1090_s22, 4 }
  0xbe   : > { %s264_s19 = scalar_lea.vmem %s1088_s6, %s800_s7 }
  0xc1   : > { %329 = vrot.lane.b32.xlu1 %v936_v20, %s871_s17  ;;  %321 = vrot.lane.b32.xlu0 %v938_v21, %s871_s17 }
  0xc5   : > { %327 = vrot.lane.b32.xlu1 %v942_v27, %s871_s17  ;;  %319 = vrot.lane.b32.xlu0 %v944_v28, %s871_s17 }
  0xc9   : > { %556 = vrot.lane.b32.xlu1 %v938_v21, %s872_s24  ;;  %554 = vrot.lane.b32.xlu0 %v936_v20, %s872_s24  ;;  %v453_v21 = vmul.f32 %v448_v17, %v942_v27 }
  0xcd   : > { %552 = vrot.lane.b32.xlu1 %v944_v28, %s872_s24  ;;  %550 = vrot.lane.b32.xlu0 %v942_v27, %s872_s24  ;;  %v409_v27 = vrot.slane %v990_v34, %v404_v26 }
 0x102   : > { %v526_v38 = vpop.permute.xlu1 %525  ;;  %v524_v39 = vpop.permute.xlu0 %523 }
 0x103   : > { %v529_v40 = vsel %vm527_vm5, %v524_v39, %v526_v38  ;;  %v537_v41 = vsel %vm527_vm5, %v526_v38, %v524_v39 }
 0x104   : > { %v549_v42 = vmul.f32 %v545_v36, %v537_v41  ;;  %v548_v43 = vmul.f32 %v541_v37, %v529_v40  ;;  %v405_v40 = vrot.slane %v995_v35, %v404_v26 }
 0x106   : > { %591 = vmatprep.subr.mxu0 %v549_v42  ;;  %801 = vmatprep.subr.mxu1 %v549_v42 }
 0x107   : > { %v522_v45 = vpop.permute.xlu1 %521  ;;  %v520_v46 = vpop.permute.xlu0 %519  ;;  %592 = vmatpush1.msra.mxu0 %v548_v43  ;;  %819 = vmatpush1.msra.mxu1 %v548_v43 }
 0x108   : > { %v528_v47 = vsel %vm527_vm5, %v520_v46, %v522_v45  ;;  %v536_v48 = vsel %vm527_vm5, %v522_v45, %v520_v46 }
 0x109   : > { %v546_v49 = vmul.f32 %v541_v37, %v528_v47  ;;  %v547_v50 = vmul.f32 %v545_v36, %v536_v48  ;;  %v454_v36 = vmul.f32 %v452_v14, %v944_v28 }
 0x10b   : > { %v495_v53 = vpop.permute.xlu1 %494  ;;  %593 = vmatprep.subr.mxu0 %v547_v50  ;;  %802 = vmatprep.subr.mxu1 %v547_v50  ;;  %v493_v54 = vpop.permute.xlu0 %492  ;;  %v373_v50 = vsub.s32 1, %v984_v32 }
 0x10c   : > { %v498_v55 = vsel %vm496_vm6, %v493_v54, %v495_v53  ;;  %v506_v56 = vsel %vm496_vm6, %v495_v53, %v493_v54  ;;  %594 = vmatpush1.msra.mxu0 %v546_v49  ;;  %820 = vmatpush1.msra.mxu1 %v546_v49 }
 0x10d   : > { %v517_v57 = vmul.f32 %v510_v51, %v498_v55  ;;  %v518_v58 = vmul.f32 %v514_v52, %v506_v56 }
 0x10f   : > { %v491_v60 = vpop.permute.xlu1 %490  ;;  %595 = vmatprep.subr.mxu0 %v518_v58  ;;  %803 = vmatprep.subr.mxu1 %v518_v58  ;;  %v489_v61 = vpop.permute.xlu0 %488  ;;  %v378_v58 = vrot.slane %v990_v34, %v373_v50 }
 0x110   : > { %v497_v62 = vsel %vm496_vm6, %v489_v61, %v491_v60  ;;  %v505_v63 = vsel %vm496_vm6, %v491_v60, %v489_v61  ;;  %596 = vmatpush1.msra.mxu0 %v517_v57  ;;  %821 = vmatpush1.msra.mxu1 %v517_v57  ;;  %v374_v57 = vrot.slane %v995_v35, %v373_v50 }
 0x111   : > { %v515_v0 = vmul.f32 %v510_v51, %v497_v62  ;;  %v516_v1 = vmul.f32 %v514_v52, %v505_v63 }
 0x113   : > { %v464_v4 = vpop.permute.xlu1 %463  ;;  %597 = vmatprep.subr.mxu0 %v516_v1  ;;  %804 = vmatprep.subr.mxu1 %v516_v1  ;;  %v462_v5 = vpop.permute.xlu0 %461  ;;  %v342_v1 = vsub.s32 0, %v984_v32 }
 0x114   : > { %v467_v7 = vsel %vm465_vm7, %v462_v5, %v464_v4  ;;  %v475_v8 = vsel %vm465_vm7, %v464_v4, %v462_v5  ;;  %598 = vmatpush1.msra.mxu0 %v515_v0  ;;  %822 = vmatpush1.msra.mxu1 %v515_v0 }
 0x115   : > { %v486_v9 = vmul.f32 %v479_v2, %v467_v7  ;;  %v487_v10 = vmul.f32 %v483_v3, %v475_v8  ;;  %v343_v8 = vrot.slane %v995_v35, %v342_v1 }
 0x117   : > { %v460_v11 = vpop.permute.xlu1 %459  ;;  %599 = vmatprep.subr.mxu0 %v487_v10  ;;  %805 = vmatprep.subr.mxu1 %v487_v10  ;;  %v458_v12 = vpop.permute.xlu0 %457 }
 0x118   : > { %v466_v15 = vsel %vm465_vm7, %v458_v12, %v460_v11  ;;  %v474_v16 = vsel %vm465_vm7, %v460_v11, %v458_v12  ;;  %600 = vmatpush1.msra.mxu0 %v486_v9  ;;  %823 = vmatpush1.msra.mxu1 %v486_v9  ;;  %v347_v9 = vrot.slane %v990_v34, %v342_v1 }
 0x119   : > { %v484_v18 = vmul.f32 %v479_v2, %v466_v15  ;;  %v485_v19 = vmul.f32 %v483_v3, %v474_v16 }
 0x11b   : > { %v423_v22 = vpop.permute.xlu1 %422  ;;  %601 = vmatprep.subr.mxu0 %v485_v19  ;;  %806 = vmatprep.subr.mxu1 %v485_v19  ;;  %v417_v24 = vpop.permute.xlu0 %416  ;;  %v792_v19 = vld [vmem:[%s1082_s0 + $0x10] ss:$0 sm:$0xff] }
 0x11c   : > { %v426_v30 = vsel %vm424_vm8, %v423_v22, %v417_v24  ;;  %602 = vmatpush1.msra.mxu0 %v484_v18  ;;  %824 = vmatpush1.msra.mxu1 %v484_v18  ;;  %v432_v33 = vsel %vm424_vm8, %v417_v24, %v423_v22  ;;  %v793_v22 = vld [vmem:[%s1082_s0 + $0x18] ss:$0 sm:$0xff] }
 0x11d   : > { %603 = vmatprep.subr.mxu0 %v456_v25  ;;  %807 = vmatprep.subr.mxu1 %v456_v25  ;;  %v444_v37 = vmul.f32 %v440_v23, %v426_v30  ;;  %v443_v41 = vmul.f32 %v436_v29, %v432_v33 }
 0x11e   : > { %604 = vmatpush1.msra.mxu0 %v455_v31  ;;  %825 = vmatpush1.msra.mxu1 %v455_v31 }
 0x11f   : > { %v421_v38 = vpop.permute.xlu1 %420  ;;  %605 = vmatprep.subr.mxu0 %v454_v36  ;;  %808 = vmatprep.subr.mxu1 %v454_v36  ;;  %v415_v39 = vpop.permute.xlu0 %414 }
 0x120   : > { %v425_v20 = vsel %vm424_vm8, %v421_v38, %v415_v39  ;;  %v431_v42 = vsel %vm424_vm8, %v415_v39, %v421_v38  ;;  %606 = vmatpush1.msra.mxu0 %v453_v21  ;;  %826 = vmatpush1.msra.mxu1 %v453_v21  ;;  %v581_v39 = vld [vmem:[%s1086_s4] sm:$0xff] }
 0x121   : > { %v441_v43 = vmul.f32 %v436_v29, %v431_v42  ;;  %v442_v28 = vmul.f32 %v440_v23, %v425_v20  ;;  %607 = vmatprep.subr.mxu0 %v444_v37  ;;  %809 = vmatprep.subr.mxu1 %v444_v37 }
 0x122   : > { %608 = vmatpush1.msra.mxu0 %v443_v41  ;;  %827 = vmatpush1.msra.mxu1 %v443_v41 }
 0x123   : > { %v392_v44 = vpop.permute.xlu1 %391  ;;  %v386_v45 = vpop.permute.xlu0 %385  ;;  %609 = vmatprep.subr.mxu0 %v442_v28  ;;  %810 = vmatprep.subr.mxu1 %v442_v28 }
 0x124   : > { %v395_v46 = vsel %vm393_vm9, %v392_v44, %v386_v45  ;;  %v401_v47 = vsel %vm393_vm9, %v386_v45, %v392_v44  ;;  %610 = vmatpush1.msra.mxu0 %v441_v43  ;;  %828 = vmatpush1.msra.mxu1 %v441_v43 }
 0x125   : > { %v412_v48 = vmul.f32 %v405_v40, %v401_v47  ;;  %v413_v49 = vmul.f32 %v409_v27, %v395_v46 }
 0x127   : > { %v390_v51 = vpop.permute.xlu1 %389  ;;  %v384_v52 = vpop.permute.xlu0 %383  ;;  %611 = vmatprep.subr.mxu0 %v413_v49  ;;  %811 = vmatprep.subr.mxu1 %v413_v49 }
 0x128   : > { %v394_v53 = vsel %vm393_vm9, %v390_v51, %v384_v52  ;;  %v400_v54 = vsel %vm393_vm9, %v384_v52, %v390_v51  ;;  %612 = vmatpush1.msra.mxu0 %v412_v48  ;;  %829 = vmatpush1.msra.mxu1 %v412_v48 }
 0x129   : > { %v410_v55 = vmul.f32 %v405_v40, %v400_v54  ;;  %v411_v56 = vmul.f32 %v409_v27, %v394_v53  ;;  %v583_v40 = vld [vmem:[%s1086_s4 + $0x10] sm:$0xff] }
 0x12b   : > { %v361_v59 = vpop.permute.xlu1 %360  ;;  %v355_v60 = vpop.permute.xlu0 %354  ;;  %613 = vmatprep.subr.mxu0 %v411_v56  ;;  %812 = vmatprep.subr.mxu1 %v411_v56 }
 0x12c   : > { %v364_v61 = vsel %vm362_vm4, %v361_v59, %v355_v60  ;;  %v370_v62 = vsel %vm362_vm4, %v355_v60, %v361_v59  ;;  %614 = vmatpush1.msra.mxu0 %v410_v55  ;;  %830 = vmatpush1.msra.mxu1 %v410_v55 }
 0x12d   : > { %v381_v63 = vmul.f32 %v374_v57, %v370_v62  ;;  %v382_v0 = vmul.f32 %v378_v58, %v364_v61 }
 0x12f   : > { %v359_v2 = vpop.permute.xlu1 %358  ;;  %v353_v3 = vpop.permute.xlu0 %352  ;;  %615 = vmatprep.subr.mxu0 %v382_v0  ;;  %813 = vmatprep.subr.mxu1 %v382_v0 }
 0x130   : > { %v363_v4 = vsel %vm362_vm4, %v359_v2, %v353_v3  ;;  %v369_v5 = vsel %vm362_vm4, %v353_v3, %v359_v2  ;;  %616 = vmatpush1.msra.mxu0 %v381_v63  ;;  %831 = vmatpush1.msra.mxu1 %v381_v63 }
 0x131   : > { %v379_v6 = vmul.f32 %v374_v57, %v369_v5  ;;  %v380_v7 = vmul.f32 %v378_v58, %v363_v4 }
 0x133   : > { %v330_v10 = vpop.permute.xlu1 %329  ;;  %v322_v11 = vpop.permute.xlu0 %321  ;;  %617 = vmatprep.subr.mxu0 %v380_v7  ;;  %814 = vmatprep.subr.mxu1 %v380_v7 }
 0x134   : > { %v333_v32 = vsel %vm331_vm10, %v330_v10, %v322_v11  ;;  %v339_v12 = vsel %vm331_vm10, %v322_v11, %v330_v10  ;;  %618 = vmatpush1.msra.mxu0 %v379_v6  ;;  %832 = vmatpush1.msra.mxu1 %v379_v6 }
 0x135   : > { %v350_v13 = vmul.f32 %v343_v8, %v339_v12  ;;  %v351_v14 = vmul.f32 %v347_v9, %v333_v32 }
 0x137   : > { %v328_v15 = vpop.permute.xlu1 %327  ;;  %v320_v16 = vpop.permute.xlu0 %319  ;;  %619 = vmatprep.subr.mxu0 %v351_v14  ;;  %815 = vmatprep.subr.mxu1 %v351_v14 }
 0x138   : > { %v332_v35 = vsel %vm331_vm10, %v328_v15, %v320_v16  ;;  %v338_v34 = vsel %vm331_vm10, %v320_v16, %v328_v15  ;;  %620 = vmatpush1.msra.mxu0 %v350_v13  ;;  %833 = vmatpush1.msra.mxu1 %v350_v13 }
 0x139   : > { %v348_v17 = vmul.f32 %v343_v8, %v338_v34  ;;  %v349_v18 = vmul.f32 %v347_v9, %v332_v35 }
 0x13b   : > { %v557_v23 = vpop.permute.xlu1 %556  ;;  %v555_v24 = vpop.permute.xlu0 %554  ;;  %621 = vmatprep.subr.mxu0 %v349_v18  ;;  %816 = vmatprep.subr.mxu1 %v349_v18 }
 0x13c   : > { %v560_v25 = vsel %vm558_vm11, %v555_v24, %v557_v23  ;;  %v568_v26 = vsel %vm558_vm11, %v557_v23, %v555_v24  ;;  %622 = vmatpush1.msra.mxu0 %v348_v17  ;;  %834 = vmatpush1.msra.mxu1 %v348_v17 }
 0x13d   : > { %v579_v29 = vmul.f32 %v792_v19, %v560_v25  ;;  %v580_v30 = vmul.f32 %v793_v22, %v568_v26 }
 0x13f   : > { %v553_v31 = vpop.permute.xlu1 %552  ;;  %v551_v33 = vpop.permute.xlu0 %550  ;;  %651 = vmatprep.subr.mxu0 %v580_v30  ;;  %817 = vmatprep.subr.mxu1 %v580_v30 }
 0x140   : > { %v559_v36 = vsel %vm558_vm11, %v551_v33, %v553_v31  ;;  %v567_v21 = vsel %vm558_vm11, %v553_v31, %v551_v33  ;;  %652 = vmatpush2.msra.mxu0 %v579_v29  ;;  %835 = vmatpush2.msra.mxu1 %v579_v29 }
 0x141   : > { %v577_v37 = vmul.f32 %v792_v19, %v559_v36  ;;  %v578_v38 = vmul.f32 %v793_v22, %v567_v21 }
 0x143   : > { %653 = vmatprep.subr.mxu0 %v578_v38  ;;  %818 = vmatprep.subr.mxu1 %v578_v38 }
 0x144   : > { %654 = vmatpush2.msra.mxu0 %v577_v37  ;;  %836 = vmatpush2.msra.mxu1 %v577_v37 }
 0x145   : > { %656 = vmatmul.mubr.f32.vlgmr.msra.gmra.mxu0 %v581_v39  ;;  %662 = vmatmul.mubr.f32.vlgmr.msra.gmra.mxu1 %v583_v40 }
 0x205   : > { %v657_v41 = vpop.f32.mrf.mxu0  ;;  %v663_v20 = vpop.f32.mrf.mxu1 }
 0x206   : > { %668 = vst [vmem:[%s259_s16] sm:$0xff] %v657_v41  ;;  %670 = vst [vmem:[%s259_s16 + $0x10] sm:$0xff] %v663_v20  ;;  %v678_v45 = vmul.f32 %v657_v41, %v657_v41  ;;  %v680_v48 = vmul.f32 %v663_v20, %v663_v20 }
 0x207   : > { %v659_v42 = vpop.f32.mrf.mxu0  ;;  %v665_v43 = vpop.f32.mrf.mxu1 }
 0x208   : > { %669 = vst [vmem:[%s259_s16 + $0x8] sm:$0xff] %v659_v42  ;;  %v679_v28 = vmul.f32 %v659_v42, %v659_v42  ;;  %v672_v27 = vadd.f32 %v659_v42, %v657_v41  ;;  %671 = vst [vmem:[%s259_s16 + $0x18] sm:$0xff] %v665_v43  ;;  %v675_v44 = vadd.f32 %v665_v43, %v663_v20 }
 0x209   : > { %v681_v46 = vmul.f32 %v665_v43, %v665_v43 }
 0x20a   : > { %673 = vadd.xlane.f32.xlu0 %v672_v27  ;;  %676 = vadd.xlane.f32.xlu1 %v675_v44  ;;  %v682_v47 = vadd.f32 %v679_v28, %v678_v45 }
 0x20b   : > { %v685_v49 = vadd.f32 %v681_v46, %v680_v48 }
 0x20e   : > { %683 = vadd.xlane.f32.xlu0 %v682_v47 }
 0x212   : > { %686 = vadd.xlane.f32.xlu0 %v685_v49 }
 0x293   : > { %v674_v50 = vpop.xlane.xlu0 %673  ;;  %v677_v53 = vpop.xlane.xlu1 %676 }
 0x297   : > { %v684_v51 = vpop.xlane.xlu0 %683 }
 0x298   : > { %v688_v52 = vsel %vm424_vm8, %v674_v50, %v684_v51 }
 0x299   : > { %691 = vst.msk [vmem:[%s264_s19] sm:$0xff] %vm690_vm12, %v688_v52 }
 0x29b   : > { %v687_v54 = vpop.xlane.xlu0 %686 }
 0x29c   : > { %v689_v55 = vsel %vm424_vm8, %v677_v53, %v687_v54 }
 0x29d   : > { %692 = vst.msk [vmem:[%s264_s19 + $0x8] sm:$0xff] %vm690_vm12, %v689_v55 }
 0x29e PF: > { %s17_s21 = sadd.s32 1, %s862_s21  }
 0x29f   : > { %p14_p4 = scmp.ge.s32.totalorder %s17_s21, 4  }
 0x2a1   :  { %16 = sbr.rel (!%p14_p4) target bundleno = 1 (0x1), region = 82 }

// kernel: roto_decoder_skip_block_forward.7
= control target key start
LH: loop header
LB: loop body
LE: loop exit
PB: predicated region body
PF: predicated region fallthrough
CT: control target
= control target key end

     0   :  { %s313_s12 = smov 0   ;;  %s336_s0 = inlined_call_operand.vmem [shape: f32[2,4,256], index: 0, kind: input, shape index: {}]   ;;  %s337_s1 = inlined_call_operand.vmem [shape: f32[4,1], index: 1, kind: input, shape index: {}]   ;;  %s338_s2 = inlined_call_operand.vmem [shape: f32[4,1], index: 2, kind: input, shape index: {}]   ;;  %s339_s3 = inlined_call_operand.vmem [shape: f32[2,4,256], index: 3, kind: output, shape index: {}]  }
   0x1 LB: > { %s259_s13 = sadd.s32 4294967295, %s289_s12   ;;  %p263_p0 = scmp.ge.s32.totalorder %s289_s12, 1  ;;  %s289_s12 = sphi %s313_s12, %s13_s12  }
   0x2   : > { %p137_p1 = scmp.lt.s32.totalorder %s289_s12, 3 }
   0x4   : > { %p138_p2 = pnand %p263_p0, %p137_p1 }
   0x5   : > { %p161_p3 = scmp.lt.s32.totalorder (!%p138_p2), %s259_s13, 1 }
   0x6   : > { %141 = sbr.rel (%p138_p2) target bundleno = 149 (0x95), region = 32 }
   0xb   : > { %v172_v0 = vld [vmem:[%s337_s1] sm:$0xf]  ;;  %v291_v1 = vmov 0   ;;  %v292_v3 = vmov 839922192   ;;  %v180_v5 = vlaneseq  ;;  %s341_s13 = smov (!%p161_p3, %s259_s13), 1 }
   0xc   : > { %282 = vset.pattern.permute.xlu0 %v291_v1  ;;  %v186_v2 = vld [vmem:[%s338_s2] sm:$0xf]  ;;  %v178_v4 = vunpack.c.l.s4 %v292_v3  ;;  %s270_s18 = sshll.u32 %s341_s13, 3 }
   0xd   : > { %175 = vperm.xlu0 %282, %v172_v0   ;;  %v181_v7 = vshrl.u32 %v180_v5, 7  ;;  %s165_s21 = scalar_lea.vmem %s336_s0, %s270_s18  ;;  %s170_s24 = scalar_lea.vmem %s339_s3, %s270_s18 }
   0xe   : > { %v179_v6 = vunpack.c.0.s8 %v178_v4  ;;  %v171_v11 = vld [vmem:[%s165_s21] sm:$0xff] }
  0x10   : > { %v182_v8 = vsub.s32 %v179_v6, %v181_v7 }
  0x11   : > { %189 = vperm.xlu0 %282, %v186_v2  }
  0x88   : > { %v176_v9 = vpop.permute.xlu0 %175 }
  0x89   : > { %v183_v10 = vrot.slane %v176_v9, %v182_v8 }
  0x8b   : > { %v185_v13 = vmul.f32 %v183_v10, %v171_v11 }
  0x8c   : > { %v190_v12 = vpop.permute.xlu0 %189 }
  0x8d   : > { %v197_v14 = vrot.slane %v190_v12, %v182_v8 }
  0x8f   : > { %v199_v15 = vadd.f32 %v197_v14, %v185_v13 }
  0x91   : > { %vm200_vm0 = vcmp.ge.f32.partialorder %v199_v15, 0.0  ;;  %v201_v16 = vmul.f32 0.2, %v199_v15 }
  0x93   : > { %v202_v17 = vsel %vm200_vm0, %v199_v15, %v201_v16 }
  0x94   : > { %203 = vst [vmem:[%s170_s24] sm:$0xff] %v202_v17 }
  0x95 PF: > { %s13_s12 = sadd.s32 1, %s289_s12  }
  0x96   : > { %p10_p4 = scmp.ge.s32.totalorder %s13_s12, 4  }
  0x98   :  { %12 = sbr.rel (!%p10_p4) target bundleno = 1 (0x1), region = 62 }

</bundles_post_ra>
